<compile_context>
chip_gen: v7x
topology: tpu7x:2x2x1
jax: 0.10.0
libtpu: 0.0.40
codegen_flags: <defaults>
</compile_context>

<pallas_src>
import functools
import math

import jax
import jax.numpy as jnp
from jax.experimental import pallas as pl
from jax.experimental.pallas import tpu as pltpu


# ----------------------------- Pallas kernels ------------------------------ #

def _mha_ln_kernel(xq_ref, xkv_ref, wq_ref, bq_ref, wkv_ref, bkv_ref,
                   wo_ref, bo_ref, g_ref, b_ref, mask_ref,
                   y_ref, attw_ref, *, n_heads, inv_scale, eps):
    """One batch element: fused QKV proj + per-head attention + out proj + add&LN."""
    D = wq_ref.shape[1]
    Dh = D // n_heads

    xq = xq_ref[...]                                    # (Wq, D)  (also the residual skip)
    xkv = xkv_ref[...]                                  # (Wk, D)

    # Q projection with 1/scale folded in (bias included before scaling == score/scale).
    q = (jnp.dot(xq, wq_ref[...], preferred_element_type=jnp.float32)
         + bq_ref[...]) * inv_scale                     # (Wq, D)
    # Fused K/V projection against concatenated (D, 2D) weight.
    kv = jnp.dot(xkv, wkv_ref[...], preferred_element_type=jnp.float32) + bkv_ref[...]
    k = kv[:, :D]                                       # (Wk, D)
    v = kv[:, D:]                                       # (Wk, D)

    # Per-head attention via static lane slices (no HBM transposes, no head grid axis).
    head_outs = []
    for h in range(n_heads):
        sl = slice(h * Dh, (h + 1) * Dh)
        qh = q[:, sl]                                   # (Wq, Dh)
        kh = k[:, sl]                                   # (Wk, Dh)
        vh = v[:, sl]                                   # (Wk, Dh)

        s = jnp.dot(qh, kh.T, preferred_element_type=jnp.float32)   # (Wq, Wk)
        # replicate: attention_score[mask] = 1e-10 (set, not add, before softmax)
        s = jnp.where(mask_ref[h] > 0.5, jnp.float32(1e-10), s)
        s_max = jnp.max(s, axis=-1, keepdims=True)
        p = jnp.exp(s - s_max)
        w = p * pl.reciprocal(jnp.sum(p, axis=-1, keepdims=True), approx=True)
        attw_ref[h] = w
        head_outs.append(jnp.dot(w, vh, preferred_element_type=jnp.float32))

    ao = jnp.concatenate(head_outs, axis=-1)            # (Wq, D) == 'n h w d -> n w (h d)'

    # Output projection + residual (dropout = identity) + LayerNorm.
    proj = jnp.dot(ao, wo_ref[...], preferred_element_type=jnp.float32) + bo_ref[...]
    y = xq + proj
    mean = jnp.mean(y, axis=-1, keepdims=True)
    var = jnp.mean((y - mean) ** 2, axis=-1, keepdims=True)
    y_ref[...] = (y - mean) * jax.lax.rsqrt(var + eps) * g_ref[...] + b_ref[...]


def _ff_ln_kernel(x_ref, w1_ref, b1_ref, w2_ref, b2_ref, g_ref, b_ref, y_ref, *, eps):
    """Row tile: Linear -> ReLU -> (Dropout: identity) -> Linear + residual + LN."""
    x = x_ref[...]                                      # (bm, D)
    h = jnp.dot(x, w1_ref[...], preferred_element_type=jnp.float32) + b1_ref[...]
    h = jnp.maximum(h, 0.0)
    proj = jnp.dot(h, w2_ref[...], preferred_element_type=jnp.float32) + b2_ref[...]
    y = x + proj
    mean = jnp.mean(y, axis=-1, keepdims=True)
    var = jnp.mean((y - mean) ** 2, axis=-1, keepdims=True)
    y_ref[...] = (y - mean) * jax.lax.rsqrt(var + eps) * g_ref[...] + b_ref[...]


# ------------------------------ Wrappers ----------------------------------- #

def _row_block(M, cap=512):
    """Largest multiple-of-8 divisor of M (<= cap); prefer >=2 tiles so v7x's 2 TCs
    both get work.  cap keeps the f32 (bm, Dff) hidden tile within v7x's 64 MiB VMEM."""
    cands = [b for b in range(8, min(M, cap) + 1, 8) if M % b == 0]
    if not cands:
        return M
    multi = [b for b in cands if M // b >= 2]
    return max(multi) if multi else max(cands)


def mha_ln_block(x_q, x_kv, mask, p, ln_g, ln_b, n_heads, eps=1e-5):
    """Fused MHA(x_q, x_kv, x_kv, mask) + residual + LayerNorm in one pallas_call."""
    N, Wq, D = x_q.shape
    Wk = x_kv.shape[1]
    H = n_heads
    inv_scale = 1.0 / math.sqrt(D / n_heads)

    w_kv = jnp.concatenate([p["wk"], p["wv"]], axis=1)          # (D, 2D)
    b_kv = jnp.concatenate([p["bk"], p["bv"]], axis=0).reshape(1, 2 * D)

    kernel = functools.partial(_mha_ln_kernel, n_heads=H, inv_scale=inv_scale, eps=eps)
    y, attw = pl.pallas_call(
        kernel,
        out_shape=(
            jax.ShapeDtypeStruct((N, Wq, D), jnp.float32),
            jax.ShapeDtypeStruct((N, H, Wq, Wk), jnp.float32),
        ),
        grid=(N,),
        in_specs=[
            pl.BlockSpec((None, Wq, D), lambda n: (n, 0, 0)),        # x_q
            pl.BlockSpec((None, Wk, D), lambda n: (n, 0, 0)),        # x_kv
            pl.BlockSpec((D, D), lambda n: (0, 0)),                  # wq
            pl.BlockSpec((1, D), lambda n: (0, 0)),                  # bq
            pl.BlockSpec((D, 2 * D), lambda n: (0, 0)),              # w_kv
            pl.BlockSpec((1, 2 * D), lambda n: (0, 0)),              # b_kv
            pl.BlockSpec((D, D), lambda n: (0, 0)),                  # wo
            pl.BlockSpec((1, D), lambda n: (0, 0)),                  # bo
            pl.BlockSpec((1, D), lambda n: (0, 0)),                  # ln gamma
            pl.BlockSpec((1, D), lambda n: (0, 0)),                  # ln beta
            pl.BlockSpec((None, H, Wq, Wk), lambda n: (n, 0, 0, 0)), # mask
        ],
        out_specs=(
            pl.BlockSpec((None, Wq, D), lambda n: (n, 0, 0)),
            pl.BlockSpec((None, H, Wq, Wk), lambda n: (n, 0, 0, 0)),
        ),
        compiler_params=pltpu.CompilerParams(dimension_semantics=("parallel",)),
    )(x_q, x_kv, p["wq"], p["bq"].reshape(1, D), w_kv, b_kv,
      p["wo"], p["bo"].reshape(1, D), ln_g.reshape(1, D), ln_b.reshape(1, D), mask)
    return y, attw


def ff_ln_block(x, w1, b1, w2, b2, g, b, eps=1e-5):
    """Fused FeedForward + residual + LayerNorm, row-tiled over M = N*W."""
    N, W, D = x.shape
    M = N * W
    Dff = w1.shape[1]
    bm = _row_block(M)

    y = pl.pallas_call(
        functools.partial(_ff_ln_kernel, eps=eps),
        out_shape=jax.ShapeDtypeStruct((M, D), jnp.float32),
        grid=(M // bm,),
        in_specs=[
            pl.BlockSpec((bm, D), lambda i: (i, 0)),
            pl.BlockSpec((D, Dff), lambda i: (0, 0)),
            pl.BlockSpec((1, Dff), lambda i: (0, 0)),
            pl.BlockSpec((Dff, D), lambda i: (0, 0)),
            pl.BlockSpec((1, D), lambda i: (0, 0)),
            pl.BlockSpec((1, D), lambda i: (0, 0)),
            pl.BlockSpec((1, D), lambda i: (0, 0)),
        ],
        out_specs=pl.BlockSpec((bm, D), lambda i: (i, 0)),
        compiler_params=pltpu.CompilerParams(dimension_semantics=("parallel",)),
    )(x.reshape(M, D), w1, b1.reshape(1, Dff), w2, b2.reshape(1, D),
      g.reshape(1, D), b.reshape(1, D))
    return y.reshape(N, W, D)


def decoder_layer(x, enc_out, dec_mask, enc_dec_mask, params):
    # TODO(synk): nn.Dropout layers are identity here (inference mode).
    x, atten_dec = mha_ln_block(x, x, dec_mask, params["self_atten"],
                                params["ln1_g"], params["ln1_b"], params["n_heads"])
    x, atten_enc_dec = mha_ln_block(x, enc_out, enc_dec_mask, params["enc_dec_atten"],
                                    params["ln2_g"], params["ln2_b"], params["n_heads"])
    x = ff_ln_block(x, params["ff_w1"], params["ff_b1"],
                    params["ff_w2"], params["ff_b2"],
                    params["ln3_g"], params["ln3_b"])
    return x, atten_dec, atten_enc_dec


# ------------------------------ Param init ---------------------------------- #

def init_params(key, d_model, d_ff, n_heads):
    ks = jax.random.split(key, 4)

    def lin(k, din, dout):
        kw, kb = jax.random.split(k)
        bound = 1.0 / math.sqrt(din)
        w = jax.random.uniform(kw, (din, dout), jnp.float32, -bound, bound)
        b = jax.random.uniform(kb, (dout,), jnp.float32, -bound, bound)
        return w, b

    def mha_params(k):
        k0, k1, k2, k3 = jax.random.split(k, 4)
        wq, bq = lin(k0, d_model, d_model)
        wk, bk = lin(k1, d_model, d_model)
        wv, bv = lin(k2, d_model, d_model)
        wo, bo = lin(k3, d_model, d_model)
        return dict(wq=wq, bq=bq, wk=wk, bk=bk, wv=wv, bv=bv, wo=wo, bo=bo)

    ff_w1, ff_b1 = lin(ks[2], d_model, d_ff)
    ff_w2, ff_b2 = lin(ks[3], d_ff, d_model)

    return dict(
        n_heads=n_heads,
        self_atten=mha_params(ks[0]),
        enc_dec_atten=mha_params(ks[1]),
        ff_w1=ff_w1, ff_b1=ff_b1, ff_w2=ff_w2, ff_b2=ff_b2,
        ln1_g=jnp.ones((d_model,), jnp.float32),
        ln1_b=jnp.zeros((d_model,), jnp.float32),
        ln2_g=jnp.ones((d_model,), jnp.float32),
        ln2_b=jnp.zeros((d_model,), jnp.float32),
        ln3_g=jnp.ones((d_model,), jnp.float32),
        ln3_b=jnp.zeros((d_model,), jnp.float32),
    )


# ---------------------------------- Main ------------------------------------ #

if __name__ == "__main__":
    d_model, d_ff, n_heads = 32, 64, 4
    N, W_dec, W_enc = 2, 8, 8

    key = jax.random.PRNGKey(0)
    kp, kx, ke = jax.random.split(key, 3)
    params = init_params(kp, d_model, d_ff, n_heads)

    x = jax.random.normal(kx, (N, W_dec, d_model), jnp.float32)
    enc_out = jax.random.normal(ke, (N, W_enc, d_model), jnp.float32)

    # dec_mask: causal (1. == masked -> score set to 1e-10), float32 {0,1}
    causal = jnp.triu(jnp.ones((W_dec, W_dec), jnp.float32), k=1)
    dec_mask = jnp.broadcast_to(causal, (N, n_heads, W_dec, W_dec))
    # enc_dec_mask: nothing masked
    enc_dec_mask = jnp.zeros((N, n_heads, W_dec, W_enc), jnp.float32)

    out, atten_dec, atten_enc_dec = decoder_layer(
        x, enc_out, dec_mask, enc_dec_mask, params)

    jax.block_until_ready(out)
    jax.block_until_ready(atten_dec)
    jax.block_until_ready(atten_enc_dec)

    assert out.shape == (N, W_dec, d_model)
    assert atten_dec.shape == (N, n_heads, W_dec, W_dec)
    assert atten_enc_dec.shape == (N, n_heads, W_dec, W_enc)
    print("KERNEL_OK")
</pallas_src>

<mosaic_0001>
module attributes {stable_mosaic.version = 11 : i64} {
  func.func @_mha_ln_kernel(%arg0: i32, %arg1: memref<1x8x32xf32, #tpu.memory_space<vmem>>, %arg2: memref<1x8x32xf32, #tpu.memory_space<vmem>>, %arg3: memref<32x32xf32, #tpu.memory_space<vmem>>, %arg4: memref<1x32xf32, #tpu.memory_space<vmem>>, %arg5: memref<32x64xf32, #tpu.memory_space<vmem>>, %arg6: memref<1x64xf32, #tpu.memory_space<vmem>>, %arg7: memref<32x32xf32, #tpu.memory_space<vmem>>, %arg8: memref<1x32xf32, #tpu.memory_space<vmem>>, %arg9: memref<1x32xf32, #tpu.memory_space<vmem>>, %arg10: memref<1x32xf32, #tpu.memory_space<vmem>>, %arg11: memref<1x4x8x8xf32, #tpu.memory_space<vmem>>, %arg12: memref<1x8x32xf32, #tpu.memory_space<vmem>>, %arg13: memref<1x4x8x8xf32, #tpu.memory_space<vmem>>) attributes {dimension_semantics = [#tpu.dimension_semantics<parallel>], iteration_bounds = array<i64: 2>, scalar_prefetch = 0 : i64, scratch_operands = 0 : i64, tpu.core_type = #tpu.core_type<tc>, window_params = [{transform_indices = @transform_0, window_bounds = array<i64: 1, 8, 32>}, {transform_indices = @transform_1, window_bounds = array<i64: 1, 8, 32>}, {pipeline_mode = #tpu.pipeline_mode<synchronous>, transform_indices = @transform_2, window_bounds = array<i64: 32, 32>}, {pipeline_mode = #tpu.pipeline_mode<synchronous>, transform_indices = @transform_3, window_bounds = array<i64: 1, 32>}, {pipeline_mode = #tpu.pipeline_mode<synchronous>, transform_indices = @transform_4, window_bounds = array<i64: 32, 64>}, {pipeline_mode = #tpu.pipeline_mode<synchronous>, transform_indices = @transform_5, window_bounds = array<i64: 1, 64>}, {pipeline_mode = #tpu.pipeline_mode<synchronous>, transform_indices = @transform_6, window_bounds = array<i64: 32, 32>}, {pipeline_mode = #tpu.pipeline_mode<synchronous>, transform_indices = @transform_7, window_bounds = array<i64: 1, 32>}, {pipeline_mode = #tpu.pipeline_mode<synchronous>, transform_indices = @transform_8, window_bounds = array<i64: 1, 32>}, {pipeline_mode = #tpu.pipeline_mode<synchronous>, transform_indices = @transform_9, window_bounds = array<i64: 1, 32>}, {transform_indices = @transform_10, window_bounds = array<i64: 1, 4, 8, 8>}, {transform_indices = @transform_11, window_bounds = array<i64: 1, 8, 32>}, {transform_indices = @transform_12, window_bounds = array<i64: 1, 4, 8, 8>}]} {
    %c0 = arith.constant 0 : index
    %c0_0 = arith.constant 0 : index
    %c0_1 = arith.constant 0 : index
    %0 = vector.load %arg1[%c0, %c0_0, %c0_1] : memref<1x8x32xf32, #tpu.memory_space<vmem>>, vector<1x8x32xf32>
    %1 = vector.shape_cast %0 : vector<1x8x32xf32> to vector<8x32xf32>
    %c0_2 = arith.constant 0 : index
    %c0_3 = arith.constant 0 : index
    %c0_4 = arith.constant 0 : index
    %2 = vector.load %arg2[%c0_2, %c0_3, %c0_4] : memref<1x8x32xf32, #tpu.memory_space<vmem>>, vector<1x8x32xf32>
    %3 = vector.shape_cast %2 : vector<1x8x32xf32> to vector<8x32xf32>
    %c0_5 = arith.constant 0 : index
    %c0_6 = arith.constant 0 : index
    %4 = vector.load %arg3[%c0_5, %c0_6] : memref<32x32xf32, #tpu.memory_space<vmem>>, vector<32x32xf32>
    %cst = arith.constant dense<0.000000e+00> : vector<8x32xf32>
    %5 = tpu.matmul %1, %4, %cst {dimension_numbers = #tpu.dot_dimension_numbers<[1], [0], [0], [1], [0, 0, 1, 1], [], []>} : vector<8x32xf32>, vector<32x32xf32>, vector<8x32xf32> -> vector<8x32xf32>
    %c0_7 = arith.constant 0 : index
    %c0_8 = arith.constant 0 : index
    %6 = vector.load %arg4[%c0_7, %c0_8] : memref<1x32xf32, #tpu.memory_space<vmem>>, vector<1x32xf32>
    %7 = vector.broadcast %6 : vector<1x32xf32> to vector<8x32xf32>
    %8 = arith.addf %5, %7 : vector<8x32xf32>
    %cst_9 = arith.constant 0.353553385 : f32
    %9 = vector.broadcast %cst_9 : f32 to vector<8x32xf32>
    %10 = arith.mulf %8, %9 : vector<8x32xf32>
    %c0_10 = arith.constant 0 : index
    %c0_11 = arith.constant 0 : index
    %11 = vector.load %arg5[%c0_10, %c0_11] : memref<32x64xf32, #tpu.memory_space<vmem>>, vector<32x64xf32>
    %cst_12 = arith.constant dense<0.000000e+00> : vector<8x64xf32>
    %12 = tpu.matmul %3, %11, %cst_12 {dimension_numbers = #tpu.dot_dimension_numbers<[1], [0], [0], [1], [0, 0, 1, 1], [], []>} : vector<8x32xf32>, vector<32x64xf32>, vector<8x64xf32> -> vector<8x64xf32>
    %c0_13 = arith.constant 0 : index
    %c0_14 = arith.constant 0 : index
    %13 = vector.load %arg6[%c0_13, %c0_14] : memref<1x64xf32, #tpu.memory_space<vmem>>, vector<1x64xf32>
    %14 = vector.broadcast %13 : vector<1x64xf32> to vector<8x64xf32>
    %15 = arith.addf %12, %14 : vector<8x64xf32>
    %16 = vector.extract_strided_slice %15 {offsets = [0, 0], sizes = [8, 32], strides = [1, 1]} : vector<8x64xf32> to vector<8x32xf32>
    %17 = vector.extract_strided_slice %15 {offsets = [0, 32], sizes = [8, 32], strides = [1, 1]} : vector<8x64xf32> to vector<8x32xf32>
    %18 = vector.extract_strided_slice %10 {offsets = [0, 0], sizes = [8, 8], strides = [1, 1]} : vector<8x32xf32> to vector<8x8xf32>
    %19 = vector.extract_strided_slice %16 {offsets = [0, 0], sizes = [8, 8], strides = [1, 1]} : vector<8x32xf32> to vector<8x8xf32>
    %20 = vector.extract_strided_slice %17 {offsets = [0, 0], sizes = [8, 8], strides = [1, 1]} : vector<8x32xf32> to vector<8x8xf32>
    %21 = tpu.transpose %19, [1, 0] : vector<8x8xf32> -> vector<8x8xf32>
    %cst_15 = arith.constant dense<0.000000e+00> : vector<8x8xf32>
    %22 = tpu.matmul %18, %21, %cst_15 {dimension_numbers = #tpu.dot_dimension_numbers<[1], [0], [0], [1], [0, 0, 1, 1], [], []>} : vector<8x8xf32>, vector<8x8xf32>, vector<8x8xf32> -> vector<8x8xf32>
    %c0_16 = arith.constant 0 : index
    %c0_17 = arith.constant 0 : index
    %c0_18 = arith.constant 0 : index
    %c0_19 = arith.constant 0 : index
    %23 = vector.load %arg11[%c0_16, %c0_17, %c0_18, %c0_19] : memref<1x4x8x8xf32, #tpu.memory_space<vmem>>, vector<1x1x8x8xf32>
    %24 = vector.shape_cast %23 : vector<1x1x8x8xf32> to vector<8x8xf32>
    %cst_20 = arith.constant 5.000000e-01 : f32
    %25 = vector.broadcast %cst_20 : f32 to vector<8x8xf32>
    %26 = arith.cmpf ogt, %24, %25 : vector<8x8xf32>
    %cst_21 = arith.constant 1.000000e-10 : f32
    %27 = vector.broadcast %cst_21 : f32 to vector<8x8xf32>
    %28 = arith.select %26, %27, %22 : vector<8x8xi1>, vector<8x8xf32>
    %cst_22 = arith.constant dense<0xFF800000> : vector<8xf32>
    %29 = vector.multi_reduction <maximumf>, %28, %cst_22 [1] : vector<8x8xf32> to vector<8xf32>
    %30 = vector.shape_cast %29 : vector<8xf32> to vector<8x1xf32>
    %31 = vector.broadcast %30 : vector<8x1xf32> to vector<8x8xf32>
    %32 = arith.subf %28, %31 : vector<8x8xf32>
    %33 = math.exp %32 : vector<8x8xf32>
    %cst_23 = arith.constant dense<0.000000e+00> : vector<8xf32>
    %34 = vector.multi_reduction <add>, %33, %cst_23 [1] : vector<8x8xf32> to vector<8xf32>
    %35 = vector.shape_cast %34 : vector<8xf32> to vector<8x1xf32>
    %36 = tpu.reciprocal %35 {approx = true} : vector<8x1xf32> -> vector<8x1xf32>
    %37 = vector.broadcast %36 : vector<8x1xf32> to vector<8x8xf32>
    %38 = arith.mulf %33, %37 : vector<8x8xf32>
    %c0_24 = arith.constant 0 : index
    %c0_25 = arith.constant 0 : index
    %c0_26 = arith.constant 0 : index
    %c0_27 = arith.constant 0 : index
    %39 = vector.load %arg13[%c0_24, %c0_25, %c0_26, %c0_27] : memref<1x4x8x8xf32, #tpu.memory_space<vmem>>, vector<1x1x8x8xf32>
    %40 = vector.shape_cast %39 : vector<1x1x8x8xf32> to vector<8x8xf32>
    %41 = vector.shape_cast %38 : vector<8x8xf32> to vector<1x1x8x8xf32>
    tpu.vector_store %arg13[%c0_24, %c0_25, %c0_26, %c0_27], %41 {strides = array<i32>} : memref<1x4x8x8xf32, #tpu.memory_space<vmem>>, vector<1x1x8x8xf32>,
    %cst_28 = arith.constant dense<0.000000e+00> : vector<8x8xf32>
    %42 = tpu.matmul %38, %20, %cst_28 {dimension_numbers = #tpu.dot_dimension_numbers<[1], [0], [0], [1], [0, 0, 1, 1], [], []>} : vector<8x8xf32>, vector<8x8xf32>, vector<8x8xf32> -> vector<8x8xf32>
    %43 = vector.extract_strided_slice %10 {offsets = [0, 8], sizes = [8, 8], strides = [1, 1]} : vector<8x32xf32> to vector<8x8xf32>
    %44 = vector.extract_strided_slice %16 {offsets = [0, 8], sizes = [8, 8], strides = [1, 1]} : vector<8x32xf32> to vector<8x8xf32>
    %45 = vector.extract_strided_slice %17 {offsets = [0, 8], sizes = [8, 8], strides = [1, 1]} : vector<8x32xf32> to vector<8x8xf32>
    %46 = tpu.transpose %44, [1, 0] : vector<8x8xf32> -> vector<8x8xf32>
    %cst_29 = arith.constant dense<0.000000e+00> : vector<8x8xf32>
    %47 = tpu.matmul %43, %46, %cst_29 {dimension_numbers = #tpu.dot_dimension_numbers<[1], [0], [0], [1], [0, 0, 1, 1], [], []>} : vector<8x8xf32>, vector<8x8xf32>, vector<8x8xf32> -> vector<8x8xf32>
    %c0_30 = arith.constant 0 : index
    %c1 = arith.constant 1 : index
    %c0_31 = arith.constant 0 : index
    %c0_32 = arith.constant 0 : index
    %48 = vector.load %arg11[%c0_30, %c1, %c0_31, %c0_32] : memref<1x4x8x8xf32, #tpu.memory_space<vmem>>, vector<1x1x8x8xf32>
    %49 = vector.shape_cast %48 : vector<1x1x8x8xf32> to vector<8x8xf32>
    %cst_33 = arith.constant 5.000000e-01 : f32
    %50 = vector.broadcast %cst_33 : f32 to vector<8x8xf32>
    %51 = arith.cmpf ogt, %49, %50 : vector<8x8xf32>
    %cst_34 = arith.constant 1.000000e-10 : f32
    %52 = vector.broadcast %cst_34 : f32 to vector<8x8xf32>
    %53 = arith.select %51, %52, %47 : vector<8x8xi1>, vector<8x8xf32>
    %cst_35 = arith.constant dense<0xFF800000> : vector<8xf32>
    %54 = vector.multi_reduction <maximumf>, %53, %cst_35 [1] : vector<8x8xf32> to vector<8xf32>
    %55 = vector.shape_cast %54 : vector<8xf32> to vector<8x1xf32>
    %56 = vector.broadcast %55 : vector<8x1xf32> to vector<8x8xf32>
    %57 = arith.subf %53, %56 : vector<8x8xf32>
    %58 = math.exp %57 : vector<8x8xf32>
    %cst_36 = arith.constant dense<0.000000e+00> : vector<8xf32>
    %59 = vector.multi_reduction <add>, %58, %cst_36 [1] : vector<8x8xf32> to vector<8xf32>
    %60 = vector.shape_cast %59 : vector<8xf32> to vector<8x1xf32>
    %61 = tpu.reciprocal %60 {approx = true} : vector<8x1xf32> -> vector<8x1xf32>
    %62 = vector.broadcast %61 : vector<8x1xf32> to vector<8x8xf32>
    %63 = arith.mulf %58, %62 : vector<8x8xf32>
    %c0_37 = arith.constant 0 : index
    %c1_38 = arith.constant 1 : index
    %c0_39 = arith.constant 0 : index
    %c0_40 = arith.constant 0 : index
    %64 = vector.load %arg13[%c0_37, %c1_38, %c0_39, %c0_40] : memref<1x4x8x8xf32, #tpu.memory_space<vmem>>, vector<1x1x8x8xf32>
    %65 = vector.shape_cast %64 : vector<1x1x8x8xf32> to vector<8x8xf32>
    %66 = vector.shape_cast %63 : vector<8x8xf32> to vector<1x1x8x8xf32>
    tpu.vector_store %arg13[%c0_37, %c1_38, %c0_39, %c0_40], %66 {strides = array<i32>} : memref<1x4x8x8xf32, #tpu.memory_space<vmem>>, vector<1x1x8x8xf32>,
    %cst_41 = arith.constant dense<0.000000e+00> : vector<8x8xf32>
    %67 = tpu.matmul %63, %45, %cst_41 {dimension_numbers = #tpu.dot_dimension_numbers<[1], [0], [0], [1], [0, 0, 1, 1], [], []>} : vector<8x8xf32>, vector<8x8xf32>, vector<8x8xf32> -> vector<8x8xf32>
    %68 = vector.extract_strided_slice %10 {offsets = [0, 16], sizes = [8, 8], strides = [1, 1]} : vector<8x32xf32> to vector<8x8xf32>
    %69 = vector.extract_strided_slice %16 {offsets = [0, 16], sizes = [8, 8], strides = [1, 1]} : vector<8x32xf32> to vector<8x8xf32>
    %70 = vector.extract_strided_slice %17 {offsets = [0, 16], sizes = [8, 8], strides = [1, 1]} : vector<8x32xf32> to vector<8x8xf32>
    %71 = tpu.transpose %69, [1, 0] : vector<8x8xf32> -> vector<8x8xf32>
    %cst_42 = arith.constant dense<0.000000e+00> : vector<8x8xf32>
    %72 = tpu.matmul %68, %71, %cst_42 {dimension_numbers = #tpu.dot_dimension_numbers<[1], [0], [0], [1], [0, 0, 1, 1], [], []>} : vector<8x8xf32>, vector<8x8xf32>, vector<8x8xf32> -> vector<8x8xf32>
    %c0_43 = arith.constant 0 : index
    %c2 = arith.constant 2 : index
    %c0_44 = arith.constant 0 : index
    %c0_45 = arith.constant 0 : index
    %73 = vector.load %arg11[%c0_43, %c2, %c0_44, %c0_45] : memref<1x4x8x8xf32, #tpu.memory_space<vmem>>, vector<1x1x8x8xf32>
    %74 = vector.shape_cast %73 : vector<1x1x8x8xf32> to vector<8x8xf32>
    %cst_46 = arith.constant 5.000000e-01 : f32
    %75 = vector.broadcast %cst_46 : f32 to vector<8x8xf32>
    %76 = arith.cmpf ogt, %74, %75 : vector<8x8xf32>
    %cst_47 = arith.constant 1.000000e-10 : f32
    %77 = vector.broadcast %cst_47 : f32 to vector<8x8xf32>
    %78 = arith.select %76, %77, %72 : vector<8x8xi1>, vector<8x8xf32>
    %cst_48 = arith.constant dense<0xFF800000> : vector<8xf32>
    %79 = vector.multi_reduction <maximumf>, %78, %cst_48 [1] : vector<8x8xf32> to vector<8xf32>
    %80 = vector.shape_cast %79 : vector<8xf32> to vector<8x1xf32>
    %81 = vector.broadcast %80 : vector<8x1xf32> to vector<8x8xf32>
    %82 = arith.subf %78, %81 : vector<8x8xf32>
    %83 = math.exp %82 : vector<8x8xf32>
    %cst_49 = arith.constant dense<0.000000e+00> : vector<8xf32>
    %84 = vector.multi_reduction <add>, %83, %cst_49 [1] : vector<8x8xf32> to vector<8xf32>
    %85 = vector.shape_cast %84 : vector<8xf32> to vector<8x1xf32>
    %86 = tpu.reciprocal %85 {approx = true} : vector<8x1xf32> -> vector<8x1xf32>
    %87 = vector.broadcast %86 : vector<8x1xf32> to vector<8x8xf32>
    %88 = arith.mulf %83, %87 : vector<8x8xf32>
    %c0_50 = arith.constant 0 : index
    %c2_51 = arith.constant 2 : index
    %c0_52 = arith.constant 0 : index
    %c0_53 = arith.constant 0 : index
    %89 = vector.load %arg13[%c0_50, %c2_51, %c0_52, %c0_53] : memref<1x4x8x8xf32, #tpu.memory_space<vmem>>, vector<1x1x8x8xf32>
    %90 = vector.shape_cast %89 : vector<1x1x8x8xf32> to vector<8x8xf32>
    %91 = vector.shape_cast %88 : vector<8x8xf32> to vector<1x1x8x8xf32>
    tpu.vector_store %arg13[%c0_50, %c2_51, %c0_52, %c0_53], %91 {strides = array<i32>} : memref<1x4x8x8xf32, #tpu.memory_space<vmem>>, vector<1x1x8x8xf32>,
    %cst_54 = arith.constant dense<0.000000e+00> : vector<8x8xf32>
    %92 = tpu.matmul %88, %70, %cst_54 {dimension_numbers = #tpu.dot_dimension_numbers<[1], [0], [0], [1], [0, 0, 1, 1], [], []>} : vector<8x8xf32>, vector<8x8xf32>, vector<8x8xf32> -> vector<8x8xf32>
    %93 = vector.extract_strided_slice %10 {offsets = [0, 24], sizes = [8, 8], strides = [1, 1]} : vector<8x32xf32> to vector<8x8xf32>
    %94 = vector.extract_strided_slice %16 {offsets = [0, 24], sizes = [8, 8], strides = [1, 1]} : vector<8x32xf32> to vector<8x8xf32>
    %95 = vector.extract_strided_slice %17 {offsets = [0, 24], sizes = [8, 8], strides = [1, 1]} : vector<8x32xf32> to vector<8x8xf32>
    %96 = tpu.transpose %94, [1, 0] : vector<8x8xf32> -> vector<8x8xf32>
    %cst_55 = arith.constant dense<0.000000e+00> : vector<8x8xf32>
    %97 = tpu.matmul %93, %96, %cst_55 {dimension_numbers = #tpu.dot_dimension_numbers<[1], [0], [0], [1], [0, 0, 1, 1], [], []>} : vector<8x8xf32>, vector<8x8xf32>, vector<8x8xf32> -> vector<8x8xf32>
    %c0_56 = arith.constant 0 : index
    %c3 = arith.constant 3 : index
    %c0_57 = arith.constant 0 : index
    %c0_58 = arith.constant 0 : index
    %98 = vector.load %arg11[%c0_56, %c3, %c0_57, %c0_58] : memref<1x4x8x8xf32, #tpu.memory_space<vmem>>, vector<1x1x8x8xf32>
    %99 = vector.shape_cast %98 : vector<1x1x8x8xf32> to vector<8x8xf32>
    %cst_59 = arith.constant 5.000000e-01 : f32
    %100 = vector.broadcast %cst_59 : f32 to vector<8x8xf32>
    %101 = arith.cmpf ogt, %99, %100 : vector<8x8xf32>
    %cst_60 = arith.constant 1.000000e-10 : f32
    %102 = vector.broadcast %cst_60 : f32 to vector<8x8xf32>
    %103 = arith.select %101, %102, %97 : vector<8x8xi1>, vector<8x8xf32>
    %cst_61 = arith.constant dense<0xFF800000> : vector<8xf32>
    %104 = vector.multi_reduction <maximumf>, %103, %cst_61 [1] : vector<8x8xf32> to vector<8xf32>
    %105 = vector.shape_cast %104 : vector<8xf32> to vector<8x1xf32>
    %106 = vector.broadcast %105 : vector<8x1xf32> to vector<8x8xf32>
    %107 = arith.subf %103, %106 : vector<8x8xf32>
    %108 = math.exp %107 : vector<8x8xf32>
    %cst_62 = arith.constant dense<0.000000e+00> : vector<8xf32>
    %109 = vector.multi_reduction <add>, %108, %cst_62 [1] : vector<8x8xf32> to vector<8xf32>
    %110 = vector.shape_cast %109 : vector<8xf32> to vector<8x1xf32>
    %111 = tpu.reciprocal %110 {approx = true} : vector<8x1xf32> -> vector<8x1xf32>
    %112 = vector.broadcast %111 : vector<8x1xf32> to vector<8x8xf32>
    %113 = arith.mulf %108, %112 : vector<8x8xf32>
    %c0_63 = arith.constant 0 : index
    %c3_64 = arith.constant 3 : index
    %c0_65 = arith.constant 0 : index
    %c0_66 = arith.constant 0 : index
    %114 = vector.load %arg13[%c0_63, %c3_64, %c0_65, %c0_66] : memref<1x4x8x8xf32, #tpu.memory_space<vmem>>, vector<1x1x8x8xf32>
    %115 = vector.shape_cast %114 : vector<1x1x8x8xf32> to vector<8x8xf32>
    %116 = vector.shape_cast %113 : vector<8x8xf32> to vector<1x1x8x8xf32>
    tpu.vector_store %arg13[%c0_63, %c3_64, %c0_65, %c0_66], %116 {strides = array<i32>} : memref<1x4x8x8xf32, #tpu.memory_space<vmem>>, vector<1x1x8x8xf32>,
    %cst_67 = arith.constant dense<0.000000e+00> : vector<8x8xf32>
    %117 = tpu.matmul %113, %95, %cst_67 {dimension_numbers = #tpu.dot_dimension_numbers<[1], [0], [0], [1], [0, 0, 1, 1], [], []>} : vector<8x8xf32>, vector<8x8xf32>, vector<8x8xf32> -> vector<8x8xf32>
    %118 = tpu.concatenate %42, %67, %92, %117 in 1 : vector<8x8xf32>, vector<8x8xf32>, vector<8x8xf32>, vector<8x8xf32> -> vector<8x32xf32>
    %c0_68 = arith.constant 0 : index
    %c0_69 = arith.constant 0 : index
    %119 = vector.load %arg7[%c0_68, %c0_69] : memref<32x32xf32, #tpu.memory_space<vmem>>, vector<32x32xf32>
    %cst_70 = arith.constant dense<0.000000e+00> : vector<8x32xf32>
    %120 = tpu.matmul %118, %119, %cst_70 {dimension_numbers = #tpu.dot_dimension_numbers<[1], [0], [0], [1], [0, 0, 1, 1], [], []>} : vector<8x32xf32>, vector<32x32xf32>, vector<8x32xf32> -> vector<8x32xf32>
    %c0_71 = arith.constant 0 : index
    %c0_72 = arith.constant 0 : index
    %121 = vector.load %arg8[%c0_71, %c0_72] : memref<1x32xf32, #tpu.memory_space<vmem>>, vector<1x32xf32>
    %122 = vector.broadcast %121 : vector<1x32xf32> to vector<8x32xf32>
    %123 = arith.addf %120, %122 : vector<8x32xf32>
    %124 = arith.addf %1, %123 : vector<8x32xf32>
    %cst_73 = arith.constant dense<0.000000e+00> : vector<8xf32>
    %125 = vector.multi_reduction <add>, %124, %cst_73 [1] : vector<8x32xf32> to vector<8xf32>
    %126 = vector.shape_cast %125 : vector<8xf32> to vector<8x1xf32>
    %cst_74 = arith.constant 3.200000e+01 : f32
    %127 = vector.broadcast %cst_74 : f32 to vector<8x1xf32>
    %128 = arith.divf %126, %127 : vector<8x1xf32>
    %129 = vector.broadcast %128 : vector<8x1xf32> to vector<8x32xf32>
    %130 = arith.subf %124, %129 : vector<8x32xf32>
    %131 = arith.mulf %130, %130 : vector<8x32xf32>
    %cst_75 = arith.constant dense<0.000000e+00> : vector<8xf32>
    %132 = vector.multi_reduction <add>, %131, %cst_75 [1] : vector<8x32xf32> to vector<8xf32>
    %133 = vector.shape_cast %132 : vector<8xf32> to vector<8x1xf32>
    %cst_76 = arith.constant 3.200000e+01 : f32
    %134 = vector.broadcast %cst_76 : f32 to vector<8x1xf32>
    %135 = arith.divf %133, %134 : vector<8x1xf32>
    %136 = vector.broadcast %128 : vector<8x1xf32> to vector<8x32xf32>
    %137 = arith.subf %124, %136 : vector<8x32xf32>
    %cst_77 = arith.constant 9.99999974E-6 : f32
    %138 = vector.broadcast %cst_77 : f32 to vector<8x1xf32>
    %139 = arith.addf %135, %138 : vector<8x1xf32>
    %140 = math.rsqrt %139 : vector<8x1xf32>
    %141 = vector.broadcast %140 : vector<8x1xf32> to vector<8x32xf32>
    %142 = arith.mulf %137, %141 : vector<8x32xf32>
    %c0_78 = arith.constant 0 : index
    %c0_79 = arith.constant 0 : index
    %143 = vector.load %arg9[%c0_78, %c0_79] : memref<1x32xf32, #tpu.memory_space<vmem>>, vector<1x32xf32>
    %144 = vector.broadcast %143 : vector<1x32xf32> to vector<8x32xf32>
    %145 = arith.mulf %142, %144 : vector<8x32xf32>
    %c0_80 = arith.constant 0 : index
    %c0_81 = arith.constant 0 : index
    %146 = vector.load %arg10[%c0_80, %c0_81] : memref<1x32xf32, #tpu.memory_space<vmem>>, vector<1x32xf32>
    %147 = vector.broadcast %146 : vector<1x32xf32> to vector<8x32xf32>
    %148 = arith.addf %145, %147 : vector<8x32xf32>
    %c0_82 = arith.constant 0 : index
    %c0_83 = arith.constant 0 : index
    %c0_84 = arith.constant 0 : index
    %149 = vector.load %arg12[%c0_82, %c0_83, %c0_84] : memref<1x8x32xf32, #tpu.memory_space<vmem>>, vector<1x8x32xf32>
    %150 = vector.shape_cast %149 : vector<1x8x32xf32> to vector<8x32xf32>
    %151 = vector.shape_cast %148 : vector<8x32xf32> to vector<1x8x32xf32>
    tpu.vector_store %arg12[%c0_82, %c0_83, %c0_84], %151 {strides = array<i32>} : memref<1x8x32xf32, #tpu.memory_space<vmem>>, vector<1x8x32xf32>,
    return
  }
  func.func @transform_0(%arg0: i32) -> (i32, i32, i32) {
    %c0_i32 = arith.constant 0 : i32
    %c0_i32_0 = arith.constant 0 : i32
    %c0_i32_1 = arith.constant 0 : i32
    return %arg0, %c0_i32, %c0_i32_0 : i32, i32, i32
  }
  func.func @transform_1(%arg0: i32) -> (i32, i32, i32) {
    %c0_i32 = arith.constant 0 : i32
    %c0_i32_0 = arith.constant 0 : i32
    %c0_i32_1 = arith.constant 0 : i32
    return %arg0, %c0_i32, %c0_i32_0 : i32, i32, i32
  }
  func.func @transform_2(%arg0: i32) -> (i32, i32) {
    %c0_i32 = arith.constant 0 : i32
    %c0_i32_0 = arith.constant 0 : i32
    %c0_i32_1 = arith.constant 0 : i32
    return %c0_i32, %c0_i32_0 : i32, i32
  }
  func.func @transform_3(%arg0: i32) -> (i32, i32) {
    %c0_i32 = arith.constant 0 : i32
    %c0_i32_0 = arith.constant 0 : i32
    %c0_i32_1 = arith.constant 0 : i32
    return %c0_i32, %c0_i32_0 : i32, i32
  }
  func.func @transform_4(%arg0: i32) -> (i32, i32) {
    %c0_i32 = arith.constant 0 : i32
    %c0_i32_0 = arith.constant 0 : i32
    %c0_i32_1 = arith.constant 0 : i32
    return %c0_i32, %c0_i32_0 : i32, i32
  }
  func.func @transform_5(%arg0: i32) -> (i32, i32) {
    %c0_i32 = arith.constant 0 : i32
    %c0_i32_0 = arith.constant 0 : i32
    %c0_i32_1 = arith.constant 0 : i32
    return %c0_i32, %c0_i32_0 : i32, i32
  }
  func.func @transform_6(%arg0: i32) -> (i32, i32) {
    %c0_i32 = arith.constant 0 : i32
    %c0_i32_0 = arith.constant 0 : i32
    %c0_i32_1 = arith.constant 0 : i32
    return %c0_i32, %c0_i32_0 : i32, i32
  }
  func.func @transform_7(%arg0: i32) -> (i32, i32) {
    %c0_i32 = arith.constant 0 : i32
    %c0_i32_0 = arith.constant 0 : i32
    %c0_i32_1 = arith.constant 0 : i32
    return %c0_i32, %c0_i32_0 : i32, i32
  }
  func.func @transform_8(%arg0: i32) -> (i32, i32) {
    %c0_i32 = arith.constant 0 : i32
    %c0_i32_0 = arith.constant 0 : i32
    %c0_i32_1 = arith.constant 0 : i32
    return %c0_i32, %c0_i32_0 : i32, i32
  }
  func.func @transform_9(%arg0: i32) -> (i32, i32) {
    %c0_i32 = arith.constant 0 : i32
    %c0_i32_0 = arith.constant 0 : i32
    %c0_i32_1 = arith.constant 0 : i32
    return %c0_i32, %c0_i32_0 : i32, i32
  }
  func.func @transform_10(%arg0: i32) -> (i32, i32, i32, i32) {
    %c0_i32 = arith.constant 0 : i32
    %c0_i32_0 = arith.constant 0 : i32
    %c0_i32_1 = arith.constant 0 : i32
    %c0_i32_2 = arith.constant 0 : i32
    return %arg0, %c0_i32, %c0_i32_0, %c0_i32_1 : i32, i32, i32, i32
  }
  func.func @transform_11(%arg0: i32) -> (i32, i32, i32) {
    %c0_i32 = arith.constant 0 : i32
    %c0_i32_0 = arith.constant 0 : i32
    %c0_i32_1 = arith.constant 0 : i32
    return %arg0, %c0_i32, %c0_i32_0 : i32, i32, i32
  }
  func.func @transform_12(%arg0: i32) -> (i32, i32, i32, i32) {
    %c0_i32 = arith.constant 0 : i32
    %c0_i32_0 = arith.constant 0 : i32
    %c0_i32_1 = arith.constant 0 : i32
    %c0_i32_2 = arith.constant 0 : i32
    return %arg0, %c0_i32, %c0_i32_0, %c0_i32_1 : i32, i32, i32, i32
  }
}

</mosaic_0001>

<bundles_post_ra>
// kernel: tpu_custom_call.1
= control target key start
LH: loop header
LB: loop body
LE: loop exit
PB: predicated region body
PF: predicated region fallthrough
CT: control target
= control target key end

     0   :  { %s2940_s0 = inlined_call_operand.hbm [shape: f32[2,8,32], index: 0, kind: input, shape index: {}]   ;;  %s2941_s1 = inlined_call_operand.hbm [shape: f32[2,8,32], index: 1, kind: input, shape index: {}]   ;;  %s2942_s2 = inlined_call_operand.hbm [shape: f32[32,32], index: 2, kind: input, shape index: {}]   ;;  %s2943_s3 = inlined_call_operand.vmem [shape: f32[1,32], index: 3, kind: input, shape index: {}]   ;;  %s2944_s4 = inlined_call_operand.hbm [shape: f32[32,64], index: 4, kind: input, shape index: {}]   ;;  %s2945_s5 = inlined_call_operand.vmem [shape: f32[1,64], index: 5, kind: input, shape index: {}]   ;;  %s2946_s6 = inlined_call_operand.hbm [shape: f32[32,32], index: 6, kind: input, shape index: {}]   ;;  %s2947_s7 = inlined_call_operand.vmem [shape: f32[1,32], index: 7, kind: input, shape index: {}]   ;;  %s2948_s8 = inlined_call_operand.vmem [shape: f32[1,32], index: 8, kind: input, shape index: {}]   ;;  %s2949_s9 = inlined_call_operand.vmem [shape: f32[1,32], index: 9, kind: input, shape index: {}]   ;;  %s2950_s10 = inlined_call_operand.hbm [shape: f32[2,4,8,8], index: 10, kind: input, shape index: {}]   ;;  %s2951_s11 = inlined_call_operand.hbm [shape: f32[2,8,32], index: 11, kind: output, shape index: {0}]   ;;  %s2952_s12 = inlined_call_operand.hbm [shape: f32[2,4,8,8], index: 12, kind: output, shape index: {1}]  }
   0x1   :  { %2966 = sst [smem:[#allocation26_spill]] %s2940_s0 }
   0x2   :  { %2967 = sst [smem:[#allocation27_spill]] %s2942_s2 }
   0x3   :  { %2968 = sst [smem:[#allocation28_spill]] %s2944_s4 }
   0x4   :  { %2969 = sst [smem:[#allocation29_spill]] %s2946_s6 }
   0x5   :  { %2970 = sst [smem:[#allocation30_spill]] %s2948_s8 }
   0x6   :  { %2971 = sst [smem:[#allocation31_spill]] %s2949_s9 }
   0x7   :  { %2972 = sst [smem:[#allocation32_spill]] %s2951_s11 }
   0x8   :  { %2973 = sst [smem:[#allocation33_spill]] %s2952_s12 }
   0x9   :  { %18 = vsyncpa [#allocation3], 0 }
   0xa   :  { %20 = vsyncpa [#allocation3 + $0x1], 0 }
   0xb   :  { %21 = vsyncpa [#allocation6], 0 }
   0xc   :  { %23 = vsyncpa [#allocation6 + $0x1], 0 }
   0xd   :  { %24 = vsyncpa [#allocation9], 0 }
   0xe   :  { %25 = vsyncpa [#allocation12], 0 }
   0xf   :  { %27 = vsyncpa [#allocation12 + $0x1], 0 }
  0x10   :  { %28 = vsyncpa [#allocation4], 0 }
  0x11   :  { %30 = vsyncpa [#allocation4 + $0x1], 0 }
  0x12   :  { %31 = vsyncpa [#allocation15], 0 }
  0x13   :  { %33 = vsyncpa [#allocation15 + $0x1], 0  ;;  %s2441_s21 = smov 0   ;;  %s2443_s22 = smov 0  }
  0x14   :  { %s2445_s23 = smov 0   ;;  %s2447_s24 = smov 0  }
  0x15 LB: > { %2974 = sst [smem:[#allocation23_spill]] %s2338_s21  ;;  %s2462_s25 = sadd.s32 4294967295, %s2350_s24   ;;  %s2350_s24 = sphi %s2447_s24, %s3014_s24   ;;  %s2346_s23 = sphi %s2445_s23, %s3013_s23   ;;  %s2342_s22 = sphi %s2443_s22, %s3012_s22   ;;  %s2338_s21 = sphi %s2441_s21, %s3011_s21  }
  0x16   : > { %s1757_s26 = sadd.s32 4294967294, %s2350_s24   ;;  %p59_p0 = scmp.ne.s32.totalorder %s2342_s22, %s2338_s21 }
  0x17   : > { %p2955_p1 = scmp.eq.s32.totalorder %s2462_s25, 0  ;;  %p309_p3 = scmp.eq.s32.totalorder %s1757_s26, 1 }
  0x18   : > { %p1758_p5 = scmp.ge.s32.totalorder %s2350_s24, 1  ;;  %p342_p7 = scmp.lt.s32.totalorder %s2350_s24, 3 }
  0x19   : > { %p2471_p4 = por %p2955_p1, %p59_p0  ;;  %p2476_p6 = por %p309_p3, %p59_p0 }
  0x1a   : > { %p2481_p8 = pnand %p1758_p5, %p342_p7  ;;  %s2352_s30 = smov [#allocation7]  }
  0x1b   : > { %s2975_s27 = scalar_select %p2471_p4, 1, 0 }
  0x1c   : > { %s2976_s28 = scalar_select %p2476_p6, 1, 0 }
  0x1d   : > { %s2978_s29 = scalar_select %p2481_p8, 1, 0 }
  0x1e   : > { %2977 = sst [smem:[#allocation24_spill]] %s2976_s28  ;;  %s354_s13 = sshll.u32 %s2352_s30, 4  ;;  %s2485_s13 = int_to_ptr.vmem [resolvable:$true] %s354_s13 }
  0x1f   : > { %p1958_p9 = pneg %p2481_p8  ;;  %s2353_s15 = smov [#allocation8]  }
  0x20   : > { %s370_s16 = sshll.u32 %s2353_s15, 4  ;;  %s2354_s17 = smov [#allocation10]   ;;  %s2496_s16 = int_to_ptr.vmem [resolvable:$true] %s370_s16 }
  0x21   : > { %p2492_p11 = pnand %p1958_p9, %p2955_p1  ;;  %s2498_s18 = sshll.u32 %s2354_s17, 4  ;;  %s387_s18 = int_to_ptr.vmem [resolvable:$true] %s2498_s18 }
  0x22   : > { %s2980_s2 = sld [smem:[#allocation27_spill]] }
  0x23   : > { %p2508_p13 = pneg %p2492_p11 }
  0x28   : > { %s2062_s26 = scalar_lea.hbm %s2980_s2, 512 }
  0x29   : > { %p2063_p12 = scmp.ne.s32.totalorder %s2980_s2, %s2062_s26  ;;  %p2069_p5 = scmp.lt.u32.totalorder %s2062_s26, %s2980_s2 }
  0x2b   : > { %p2065_p0 = pnand %p2508_p13, %p2063_p12 }
  0x2d   : > { %p2066_p3 = pneg %p2065_p0 }
  0x2f   : > { %p2071_p7 = pnand %p2069_p5, %p2066_p3 }
  0x31   : > { %2074 = shalt.err (!%p2071_p7)
}
  0x32   : > { %s2075_s28 = scalar_lea.vmem %s2485_s13, 512  ;;  %p2083_p2 = scmp.lt.s32.totalorder %s2485_s13, %s2485_s13 }
  0x33   : > { %p2076_p9 = scmp.ne.s32.totalorder %s2485_s13, %s2075_s28  ;;  %p2084_p6 = scmp.lt.s32.totalorder %s2075_s28, %s2075_s28 }
  0x35   : > { %p2078_p10 = pnand %p2076_p9, %p2508_p13  ;;  %p2085_p12 = por %p2084_p6, %p2083_p2 }
  0x37   : > { %p2079_p1 = pneg %p2078_p10 }
  0x39   : > { %p2086_p0 = pnand %p2085_p12, %p2079_p1 }
  0x3b   : > { %2089 = shalt.err (!%p2086_p0)
}
  0x3c   : > { %s2960_s19 = smov 128   ;;  %s2961_s20 = smov 8  }
  0x3d   : > { %1961 = dma.hbm_to_vmem [thread:$0]  (!%p2492_p11), %s2980_s2, 512, %s2485_s13, [#allocation6], %s2960_s19, %s2960_s19, %s2961_s20  }
  0x3e   : > { %s2982_s4 = sld [smem:[#allocation28_spill]] }
  0x44   : > { %s2090_s28 = scalar_lea.hbm %s2982_s4, 512 }
  0x45   : > { %p2091_p1 = scmp.ne.s32.totalorder %s2982_s4, %s2090_s28  ;;  %p2097_p10 = scmp.lt.u32.totalorder %s2090_s28, %s2982_s4 }
  0x47   : > { %p2093_p2 = pnand %p2091_p1, %p2508_p13 }
  0x49   : > { %p2094_p6 = pneg %p2093_p2 }
  0x4b   : > { %p2099_p3 = pnand %p2097_p10, %p2094_p6 }
  0x4d   : > { %2102 = shalt.err (!%p2099_p3)
}
  0x4e   : > { %s2103_s13 = scalar_lea.vmem %s2496_s16, 512  ;;  %p2111_p12 = scmp.lt.s32.totalorder %s2496_s16, %s2496_s16 }
  0x4f   : > { %p2104_p5 = scmp.ne.s32.totalorder %s2496_s16, %s2103_s13  ;;  %p2112_p0 = scmp.lt.s32.totalorder %s2103_s13, %s2103_s13 }
  0x51   : > { %p2106_p7 = pnand %p2104_p5, %p2508_p13  ;;  %p2113_p1 = por %p2112_p0, %p2111_p12 }
  0x53   : > { %p2107_p9 = pneg %p2106_p7 }
  0x55   : > { %p2114_p2 = pnand %p2113_p1, %p2107_p9 }
  0x57   : > { %2117 = shalt.err (!%p2114_p2)
}
  0x58   : > { %1964 = dma.hbm_to_vmem [thread:$0]  (!%p2492_p11), %s2982_s4, 512, %s2496_s16, [#allocation9], %s2960_s19, %s2960_s19, %s2961_s20  }
  0x59   : > { %s2983_s6 = sld [smem:[#allocation29_spill]] }
  0x5f   : > { %s2118_s26 = scalar_lea.hbm %s2983_s6, 512 }
  0x60   : > { %p2119_p6 = scmp.ne.s32.totalorder %s2983_s6, %s2118_s26  ;;  %p2125_p5 = scmp.lt.u32.totalorder %s2118_s26, %s2983_s6 }
  0x62   : > { %p2121_p10 = pnand %p2119_p6, %p2508_p13 }
  0x64   : > { %p2122_p3 = pneg %p2121_p10 }
  0x66   : > { %p2127_p7 = pnand %p2125_p5, %p2122_p3 }
  0x68   : > { %2130 = shalt.err (!%p2127_p7)
}
  0x69   : > { %s2131_s13 = scalar_lea.vmem %s387_s18, 512  ;;  %p2139_p1 = scmp.lt.s32.totalorder %s387_s18, %s387_s18 }
  0x6a   : > { %p2132_p9 = scmp.ne.s32.totalorder %s387_s18, %s2131_s13  ;;  %p2140_p2 = scmp.lt.s32.totalorder %s2131_s13, %s2131_s13 }
  0x6c   : > { %p2134_p12 = pnand %p2132_p9, %p2508_p13  ;;  %p2141_p4 = por %p2140_p2, %p2139_p1 }
  0x6e   : > { %p2135_p0 = pneg %p2134_p12 }
  0x70   : > { %p2142_p8 = pnand %p2141_p4, %p2135_p0 }
  0x72   : > { %2145 = shalt.err (!%p2142_p8)
}
  0x73   : > { %1967 = dma.hbm_to_vmem [thread:$0]  (!%p2492_p11), %s2983_s6, 512, %s387_s18, [#allocation9], %s2960_s19, %s2960_s19, %s2961_s20  }
  0x74   : > { %s2581_s21 = sadd.s32 1, %s2350_s24   ;;  %s46_s9 = sadd.s32 1, %s2346_s23 }
  0x75   : > { %s43_s14 = ssub.s32 %s2350_s24, %s2581_s21  ;;  %p53_p8 = scmp.ne.s32.totalorder %s2346_s23, %s2342_s22 }
  0x76   : > { %p44_p4 = scmp.eq.s32.totalorder %s43_s14, 0  ;;  %p54_p13 = scmp.eq.s32.totalorder %s2350_s24, 0 }
  0x77   : > { %p1988_p6 = scmp.lt.s32.totalorder %s2350_s24, 2  ;;  %p2985_p3 = scmp.eq.s32.totalorder %s2462_s25, 1 }
  0x78   : > { %s2591_s11 = scalar_select %p44_p4, %s2346_s23, %s46_s9  }
  0x79   : > { %p55_p10 = por %p54_p13, %p53_p8  ;;  %p2595_p5 = por %p2985_p3, %p53_p8 }
  0x7a   : > { %2984 = sst [smem:[#allocation25_spill]] %s2591_s11  ;;  %s2600_s26 = sand.u32 1, %s2346_s23  }
  0x7b   : > { %s2986_s12 = scalar_select %p2595_p5, 1, 0 }
  0x7c   : > { %s1764_s18 = sshll.u32 %s2350_s24, 7  ;;  %s2962_s30 = sshll.u32 %s2600_s26, 3 }
  0x7d   : > { %s2987_s0 = sld [smem:[#allocation26_spill]]  ;;  %s413_s13 = scalar_lea.vmem [#allocation2], %s2962_s30 }
  0x7e   : > { %s420_s16 = sshll.u32 %s413_s13, 4  ;;  %p2611_p11 = pnand %p1988_p6, %p55_p10  ;;  %s2615_s16 = int_to_ptr.vmem [resolvable:$true] %s420_s16 }
  0x7f   : > { %s2620_s15 = scalar_lea.hbm %s2941_s1, %s1764_s18  ;;  %s410_s17 = scalar_lea.sflag [#allocation3], %s2600_s26 }
  0x80   : > { %s2988_s8 = scalar_select %p2611_p11, 1, 0 }
  0x81   : > { %p2627_p9 = pneg %p2611_p11 }
  0x83   : > { %s2607_s28 = scalar_lea.hbm %s2987_s0, %s1764_s18  ;;  %s2151_s2 = scalar_lea.hbm %s2987_s0, 256 }
  0x84   : > { %s2146_s19 = scalar_lea.hbm %s2607_s28, 128  ;;  %p2152_p1 = scmp.lt.u32.totalorder %s2607_s28, %s2987_s0 }
  0x85   : > { %p2147_p7 = scmp.ne.s32.totalorder %s2607_s28, %s2146_s19  ;;  %p2153_p2 = scmp.lt.u32.totalorder %s2151_s2, %s2146_s19 }
  0x86   : > { %p2155_p8 = scmp.lt.u32.totalorder %s2146_s19, %s2607_s28 }
  0x87   : > { %p2149_p12 = pnand %p2627_p9, %p2147_p7  ;;  %p2154_p4 = por %p2153_p2, %p2152_p1 }
  0x89   : > { %p2150_p0 = pneg %p2149_p12  ;;  %p2156_p13 = por %p2155_p8, %p2154_p4 }
  0x8b   : > { %p2157_p6 = pnand %p2156_p13, %p2150_p0 }
  0x8d   : > { %2160 = shalt.err (!%p2157_p6)
}
  0x8e   : > { %s2161_s18 = scalar_lea.vmem %s2615_s16, 128  ;;  %s2357_s30 = smov [#allocation2]  }
  0x8f   : > { %p2162_p10 = scmp.ne.s32.totalorder %s2615_s16, %s2161_s18  ;;  %s2166_s9 = sshll.u32 %s2357_s30, 4  ;;  %s2167_s9 = int_to_ptr.vmem [resolvable:$false] %s2166_s9 }
  0x90   : > { %s2168_s4 = scalar_lea.vmem %s2167_s9, 256  ;;  %p2169_p12 = scmp.lt.s32.totalorder %s2615_s16, %s2167_s9 }
  0x91   : > { %p2164_p3 = pnand %p2162_p10, %p2627_p9  ;;  %p2170_p5 = scmp.lt.s32.totalorder %s2168_s4, %s2161_s18 }
  0x93   : > { %p2165_p7 = pneg %p2164_p3  ;;  %p2171_p1 = por %p2170_p5, %p2169_p12 }
  0x95   : > { %p2172_p2 = pnand %p2171_p1, %p2165_p7 }
  0x97   : > { %2175 = shalt.err (!%p2172_p2)
}
  0x98   : > { %1971 = dma.hbm_to_vmem [thread:$0]  (!%p2611_p11), %s2607_s28, 128, %s2615_s16, %s410_s17  }
  0x99   : > { %s427_s2 = sand.u32 1, %s2350_s24   ;;  %s2990_s19 = sshll.u32 %s2600_s26, 3 }
  0x9a   : > { %s431_s13 = scalar_lea.vmem [#allocation5], %s2990_s19  ;;  %s428_s18 = scalar_lea.sflag [#allocation6], %s427_s2 }
  0x9b   : > { %s438_s14 = sshll.u32 %s431_s13, 4  ;;  %s2176_s30 = scalar_lea.hbm %s2620_s15, 128  ;;  %s439_s14 = int_to_ptr.vmem [resolvable:$true] %s438_s14 }
  0x9c   : > { %p2177_p5 = scmp.ne.s32.totalorder %s2620_s15, %s2176_s30  ;;  %s2181_s0 = scalar_lea.hbm %s2941_s1, 256 }
  0x9d   : > { %p2182_p8 = scmp.lt.u32.totalorder %s2620_s15, %s2941_s1  ;;  %p2183_p13 = scmp.lt.u32.totalorder %s2181_s0, %s2176_s30 }
  0x9e   : > { %p2179_p0 = pnand %p2177_p5, %p2627_p9  ;;  %p2185_p10 = scmp.lt.u32.totalorder %s2176_s30, %s2620_s15 }
  0x9f   : > { %p2184_p6 = por %p2183_p13, %p2182_p8 }
  0xa0   : > { %p2180_p4 = pneg %p2179_p0 }
  0xa1   : > { %p2186_p3 = por %p2185_p10, %p2184_p6 }
  0xa3   : > { %p2187_p7 = pnand %p2186_p3, %p2180_p4 }
  0xa5   : > { %2190 = shalt.err (!%p2187_p7)
}
  0xa6   : > { %s2191_s28 = scalar_lea.vmem %s439_s14, 128  ;;  %s2358_s16 = smov [#allocation5]  }
  0xa7   : > { %p2192_p12 = scmp.ne.s32.totalorder %s439_s14, %s2191_s28  ;;  %s2196_s17 = sshll.u32 %s2358_s16, 4  ;;  %s2197_s17 = int_to_ptr.vmem [resolvable:$false] %s2196_s17 }
  0xa8   : > { %s2198_s2 = scalar_lea.vmem %s2197_s17, 256  ;;  %p2199_p5 = scmp.lt.s32.totalorder %s439_s14, %s2197_s17 }
  0xa9   : > { %p2194_p1 = pnand %p2192_p12, %p2627_p9  ;;  %p2200_p0 = scmp.lt.s32.totalorder %s2198_s2, %s2191_s28 }
  0xab   : > { %p2195_p2 = pneg %p2194_p1  ;;  %p2201_p11 = por %p2200_p0, %p2199_p5 }
  0xad   : > { %p2202_p8 = pnand %p2201_p11, %p2195_p2 }
  0xaf   : > { %2205 = shalt.err (!%p2202_p8)
}
  0xb0   : > { %p2991_p13 = scmp.ne.s32.totalorder %s2988_s8, 0  ;;  %s1767_s0 = sshll.u32 %s2600_s26, 5 }
  0xb1   : > { %s1812_s6 = sshll.u32 %s2350_s24, 9  ;;  %s449_s30 = scalar_lea.vmem [#allocation11], %s1767_s0 }
  0xb2   : > { %1974 = dma.hbm_to_vmem [thread:$0]  (!%p2991_p13), %s2620_s15, 128, %s439_s14, %s428_s18  }
  0xb3   : > { %s2675_s13 = scalar_lea.hbm %s2950_s10, %s1812_s6  ;;  %s456_s9 = sshll.u32 %s449_s30, 4  ;;  %s2677_s9 = int_to_ptr.vmem [resolvable:$true] %s456_s9 }
  0xb4   : > { %s446_s4 = scalar_lea.sflag [#allocation12], %s2600_s26  ;;  %s2206_s28 = scalar_lea.hbm %s2675_s13, 512 }
  0xb5   : > { %p2207_p11 = scmp.ne.s32.totalorder %s2675_s13, %s2206_s28  ;;  %s2211_s18 = scalar_lea.hbm %s2950_s10, 1024 }
  0xb6   : > { %p2212_p10 = scmp.lt.u32.totalorder %s2675_s13, %s2950_s10  ;;  %p2213_p3 = scmp.lt.u32.totalorder %s2211_s18, %s2206_s28 }
  0xb7   : > { %p2209_p4 = pnand %p2207_p11, %p2627_p9  ;;  %p2215_p12 = scmp.lt.u32.totalorder %s2206_s28, %s2675_s13 }
  0xb8   : > { %p2214_p7 = por %p2213_p3, %p2212_p10 }
  0xb9   : > { %p2210_p6 = pneg %p2209_p4 }
  0xba   : > { %p2216_p1 = por %p2215_p12, %p2214_p7 }
  0xbc   : > { %p2217_p2 = pnand %p2216_p1, %p2210_p6 }
  0xbe   : > { %2220 = shalt.err (!%p2217_p2)
}
  0xbf   : > { %s2221_s2 = scalar_lea.vmem %s2677_s9, 512  ;;  %s2359_s0 = smov [#allocation11]  }
  0xc0   : > { %p2222_p5 = scmp.ne.s32.totalorder %s2677_s9, %s2221_s2  ;;  %s2226_s6 = sshll.u32 %s2359_s0, 4  ;;  %s2227_s6 = int_to_ptr.vmem [resolvable:$false] %s2226_s6 }
  0xc1   : > { %s2228_s11 = scalar_lea.vmem %s2227_s6, 1024  ;;  %p2229_p11 = scmp.lt.s32.totalorder %s2677_s9, %s2227_s6 }
  0xc2   : > { %p2224_p0 = pnand %p2222_p5, %p2627_p9  ;;  %p2230_p4 = scmp.lt.s32.totalorder %s2228_s11, %s2221_s2 }
  0xc4   : > { %p2225_p8 = pneg %p2224_p0  ;;  %p2231_p10 = por %p2230_p4, %p2229_p11 }
  0xc6   : > { %p2232_p3 = pnand %p2231_p10, %p2225_p8 }
  0xc8   : > { %2235 = shalt.err (!%p2232_p3)
}
  0xc9   : > { %s2992_s19 = smov 8   ;;  %s2993_s30 = smov 128  }
  0xca   : > { %1977 = dma.hbm_to_vmem [thread:$0]  (!%p2991_p13), %s2675_s13, 512, %s2677_s9, %s446_s4, %s2993_s30, %s2993_s30, %s2992_s19  }
  0xcb   : > { %p2994_p9 = scmp.ne.s32.totalorder %s2978_s29, 0 }
  0xcc   : > { %s2709_s20 = sand.u32 (!%p2994_p9), 1, %s2342_s22   ;;  %p2995_p6 = scmp.ne.s32.totalorder (!%p2994_p9), %s2975_s27, 0 }
  0xcd   : > { %468 = sbr.rel (%p2994_p9) target bundleno = 1976 (0x7b8), region = 64  ;;  %s2712_s28 = sshll.u32 (!%p2994_p9), %s2709_s20, 3 }
  0xce   : > { %s471_s8 = scalar_lea.sflag (!%p2994_p9), [#allocation3], %s2709_s20  ;;  %s474_s15 = scalar_lea.vmem (!%p2994_p9), [#allocation2], %s2712_s28 }
  0xd4   : > { %2309 = dma.done.wait (%p2995_p6), %s471_s8, 128  }
  0xd5   : > { %2311 = vsyncadd (%p2995_p6), %s471_s8, 4294967168  ;;  %s479_s29 = sand.u32 1, %s2462_s25   ;;  %s483_s13 = scalar_lea.vmem [#allocation5], %s2712_s28 }
  0xd6   : > { %s480_s26 = scalar_lea.sflag [#allocation6], %s479_s29 }
  0xd7   : > { %2313 = dma.done.wait (%p2995_p6), %s480_s26, 128  }
  0xd8   : > { %2315 = vsyncadd (%p2995_p6), %s480_s26, 4294967168  ;;  %p2996_p13 = scmp.eq.s32.totalorder %s2462_s25, 0 }
  0xda   : > { %2317 = dma.done.wait (%p2996_p13), [#allocation6], 512   ;;  %p2997_p7 = pmov %p2996_p13 }
  0xdc   : > { %2319 = vsyncadd (%p2997_p7), [#allocation6], 4294966784  ;;  %p2998_p12 = pmov %p2997_p7 }
  0xdd   : > { %p2999_p1 = pmov %p2997_p7 }
  0xde   : > { %2321 = dma.done.wait (%p2998_p12), [#allocation9], 1024  }
  0xdf   : > { %2323 = vsyncadd (%p2999_p1), [#allocation9], 4294966272  ;;  %s1776_s9 = sshll.u32 %s2709_s20, 5  ;;  %s501_s4 = scalar_lea.sflag [#allocation12], %s2709_s20 }
  0xe0   : > { %s2738_s14 = scalar_lea.vmem [#allocation11], %s1776_s9 }
  0xe1   : > { %2325 = dma.done.wait (%p2995_p6), %s501_s4, 512  }
  0xe2   : > { %2327 = vsyncadd (%p2995_p6), %s501_s4, 4294966784  ;;  %v2360_v0 = vmov 0.0|0.0   ;;  %vm2361_vm0 = vmmov 0   ;;  %v2362_v1 = vmov 0.0   ;;  %v648_v2 = vld [vmem:[#allocation8] sm:$0xff]  ;;  %v649_v3 = vld [vmem:[#allocation8 + $0x8] sm:$0xff] }
  0xe3   : > { %1924 = vmatprep.subr.bf16.mxu1 %v2360_v0  ;;  %1918 = vmatprep.subr.bf16.mxu0 %v2360_v0  ;;  %v562_v4 = vld [vmem:[#allocation7] sm:$0xff]  ;;  %v1925_v5 = vpack.c.bf16 %v649_v3, %v648_v2  ;;  %v563_v6 = vld [vmem:[#allocation7 + $0x8] sm:$0xff]  ;;  %v650_v7 = vld [vmem:[#allocation8 + $0x10] sm:$0xff]  ;;  %vm573_vm1 = vcmask 261120   ;;  %vm732_vm2 = vcmask 64512   ;;  %s2363_s2 = smov 112  }
  0xe4   : > { %1864 = vmatprep.mubr.msk.f32.mxu1 %vm2361_vm0, %v2362_v1  ;;  %1853 = vmatprep.mubr.msk.f32.mxu0 %vm2361_vm0, %v2362_v1  ;;  %v651_v8 = vld [vmem:[#allocation8 + $0x18] sm:$0xff]  ;;  %v1919_v9 = vpack.c.bf16 %v563_v6, %v562_v4  ;;  %v564_v10 = vld [vmem:[#allocation7 + $0x10] sm:$0xff]  ;;  %v2756_v15 = vld [vmem:[%s474_s15] sm:$0xff]  ;;  %s2364_s0 = smov 120   ;;  %s2365_s6 = smov 104   ;;  %vm1426_vm7 = vcmask 130048  }
  0xe5   : > { %v565_v11 = vld [vmem:[#allocation7 + $0x18] sm:$0xff]  ;;  %1926 = vmatpush3.bf16.msra.mxu1 %v1925_v5  ;;  %v1928_v12 = vpack.c.bf16 %v651_v8, %v650_v7  ;;  %v1781_v16 = vld [vmem:[%s2945_s5] ss:$0 sm:$0xff]  ;;  %v1788_v36 = vld [vmem:[%s2738_s14 + $0x8] sm:$0xff]  ;;  %s2366_s11 = smov 96   ;;  %s2367_s19 = smov 80  }
  0xe6   : > { %1920 = vmatpush3.bf16.msra.mxu0 %v1919_v9  ;;  %1927 = vmatprep.subr.bf16.mxu1 %v2360_v0  ;;  %v1922_v13 = vpack.c.bf16 %v565_v11, %v564_v10  ;;  %v561_v14 = vld [vmem:[%s483_s13] sm:$0xff]  ;;  %v1779_v17 = vld [vmem:[%s2943_s3] ss:$0 sm:$0xff]  ;;  %vm980_vm4 = vcmp.gt.f32.partialorder %v1788_v36, 0.5  ;;  %s2368_s30 = smov 72   ;;  %s2369_s8 = smov 88  }
  0xe7   : > { %1921 = vmatprep.subr.bf16.mxu0 %v2360_v0  ;;  %v809_v31 = vld [vmem:[%s2738_s14] sm:$0xff]  ;;  %v1793_v37 = vld [vmem:[%s2738_s14 + $0x10] sm:$0xff]  ;;  %v1798_v42 = vld [vmem:[%s2738_s14 + $0x18] sm:$0xff]  ;;  %s2818_s15 = scalar_lea.vmem [#allocation14], %s1776_s9  ;;  %s2370_s29 = smov 8   ;;  %vm1428_vm8 = vcmask 195584  }
  0xe8   : > { %vm810_vm3 = vcmp.gt.f32.partialorder %v809_v31, 0.5  ;;  %vm1151_vm5 = vcmp.gt.f32.partialorder %v1793_v37, 0.5  ;;  %vm1322_vm6 = vcmp.gt.f32.partialorder %v1798_v42, 0.5  ;;  %v1432_v31 = vld [vmem:[#allocation10 + $0x10] sm:$0xff]  ;;  %s2371_s26 = smov 16   ;;  %s2372_s13 = smov 24  }
  0xe9   : > { %1929 = vmatpush3.bf16.msra.mxu1 %v1928_v12  ;;  %s1813_s14 = sshll.u32 %s2462_s25, 9  ;;  %s1578_s27 = sshll.u32 %s2818_s15, 4  ;;  %s2857_s27 = int_to_ptr.vmem [resolvable:$true] %s1578_s27 }
  0xea   : > { %1923 = vmatpush3.bf16.msra.mxu0 %v1922_v13  ;;  %1867 = vmatprep.subr.mxu1 %v2362_v1  ;;  %s3000_s17 = sld [smem:[#allocation33_spill]]  ;;  %p3001_p5 = scmp.ne.s32.totalorder %s2986_s12, 0 }
  0xeb   : > { %1877 = vmatprep.subr.mxu0 %v2362_v1 }
  0xec   : > { %1865 = vmatmul.mubr.msk.f32.vlgmr.msra.gmra.mrb[0].mxu1 %vm573_vm1, %v561_v14 }
  0xed   : > { %1854 = vmatmul.mubr.msk.f32.vlgmr.msra.gmra.mrb[0].mxu0 %vm573_vm1, %v2756_v15  ;;  %1869 = vmatprep.mubr.msk.f32.mxu1 %vm2361_vm0, %v2362_v1 }
  0xee   : > { %1879 = vmatprep.mubr.msk.f32.mxu0 %vm2361_vm0, %v2362_v1 }
 0x1bf   : > { %v728_v18 = vpop.f32.mrb[0].mxu1 }
 0x1c0   : > { %v2773_v19 = vadd.f32 %v1781_v16, %v728_v18  ;;  %v643_v20 = vpop.f32.mrb[0].mxu0  ;;  %v1866_v21 = vpop.f32.mrb[1].mxu1 }
 0x1c1   : > { %v644_v22 = vadd.f32 %v1779_v17, %v643_v20  ;;  %v1855_v23 = vpop.f32.mrb[1].mxu0 }
 0x1c2   : > { %1073 = vrot.lane.b32.xlu1 %v2773_v19, %s2363_s2  ;;  %902 = vrot.lane.b32.xlu0 %v2773_v19, %s2364_s0 }
 0x1c3   : > { %v647_v24 = vmul.f32 0.35355338, %v644_v22  ;;  %1868 = vmatpush3.xpose.msk.msra.mxu1 %vm732_vm2, %v2773_v19 }
 0x1c4   : > { %1872 = vmatprep.subr.mxu1 %v2362_v1 }
 0x1c6   : > { %1870 = vmatmul.mubr.msk.f32.vlgmr.msra.gmra.mrb[2].mxu1 %vm732_vm2, %v647_v24  ;;  %1071 = vrot.lane.b32.xlu1 %v647_v24, %s2363_s2  ;;  %s2855_s2 = scalar_lea.hbm %s3000_s17, %s1813_s14 }
 0x1c7   : > { %900 = vrot.lane.b32.xlu0 %v647_v24, %s2364_s0  ;;  %1874 = vmatprep.mubr.msk.f32.mxu1 %vm2361_vm0, %v2362_v1  ;;  %s1552_s0 = scalar_lea.sflag [#allocation15], %s2709_s20 }
 0x1ca   : > { %1242 = vrot.lane.b32.xlu1 %v647_v24, %s2365_s6 }
 0x1cb   : > { %1244 = vrot.lane.b32.xlu0 %v2773_v19, %s2365_s6  ;;  %s2236_s6 = scalar_lea.vmem %s2857_s27, 512 }
 0x1cc   : > { %p2237_p2 = scmp.ne.s32.totalorder %s2857_s27, %s2236_s6 }
 0x1ce   : > { %p2238_p0 = pnand %p2237_p2, %p3001_p5 }
 0x1d0   : > { %p2239_p8 = pneg %p2238_p0 }
 0x234   : > { %v903_v25 = vpop.permute.xlu0 %902  ;;  %v1074_v26 = vpop.permute.xlu1 %1073 }
 0x235   : > { %1878 = vmatpush3.xpose.msk.msra.mxu0 %vm732_vm2, %v903_v25 }
 0x236   : > { %1887 = vmatprep.subr.mxu0 %v2362_v1 }
 0x238   : > { %v1072_v28 = vpop.permute.xlu1 %1071 }
 0x239   : > { %v901_v27 = vpop.permute.xlu0 %900 }
 0x23a   : > { %1880 = vmatmul.mubr.msk.f32.vlgmr.msra.gmra.mrb[2].mxu0 %vm732_vm2, %v901_v27 }
 0x23b   : > { %1888 = vmatpush3.xpose.msk.msra.mxu0 %vm732_vm2, %v1074_v26  ;;  %1889 = vmatprep.mubr.msk.f32.mxu0 %vm2361_vm0, %v2362_v1 }
 0x23c   : > { %1897 = vmatprep.subr.mxu0 %v2362_v1  ;;  %v1243_v30 = vpop.permute.xlu1 %1242 }
 0x23d   : > { %v1245_v29 = vpop.permute.xlu0 %1244 }
 0x23e   : > { %1890 = vmatmul.mubr.msk.f32.vlgmr.msra.gmra.mrb[4].mxu0 %vm732_vm2, %v1072_v28  ;;  %v1430_v28 = vld [vmem:[#allocation10] sm:$0xff] }
 0x23f   : > { %1898 = vmatpush3.xpose.msk.msra.mxu0 %vm732_vm2, %v1245_v29  ;;  %1899 = vmatprep.mubr.msk.f32.mxu0 %vm2361_vm0, %v2362_v1  ;;  %v1431_v29 = vld [vmem:[#allocation10 + $0x8] sm:$0xff] }
 0x240   : > { %1930 = vmatprep.subr.bf16.mxu0 %v2360_v0 }
 0x242   : > { %1900 = vmatmul.mubr.msk.f32.vlgmr.msra.gmra.mrb[6].mxu0 %vm732_vm2, %v1243_v30  ;;  %v1931_v30 = vpack.c.bf16 %v1431_v29, %v1430_v28 }
 0x243   : > { %1915 = vmatprep.mubr.msk.f32.mxu0 %vm2361_vm0, %v2362_v1 }
 0x244   : > { %1932 = vmatpush3.bf16.msra.mxu0 %v1931_v30 }
 0x245   : > { %1933 = vmatprep.subr.bf16.mxu0 %v2360_v0 }
 0x299   : > { %v805_v32 = vpop.f32.mrb[2].mxu1 }
 0x29a   : > { %v811_v33 = vsel %vm810_vm3, 1e-10, %v805_v32  ;;  %v1871_v34 = vpop.f32.mrb[3].mxu1  ;;  %v1433_v32 = vld [vmem:[#allocation10 + $0x18] sm:$0xff] }
 0x29b   : > { %v812_v35 = vsel %vm732_vm2, %v811_v33, -inf }
 0x29c   : > { %813 = vmax.xlane.f32.xlu0 %v812_v35 }
 0x30d   : > { %v974_v38 = vpop.f32.mrb[2].mxu0 }
 0x30e   : > { %v981_v39 = vsel %vm980_vm4, 1e-10, %v974_v38  ;;  %v1881_v40 = vpop.f32.mrb[3].mxu0 }
 0x30f   : > { %v982_v41 = vsel %vm732_vm2, %v981_v39, -inf }
 0x310   : > { %983 = vmax.xlane.f32.xlu1 %v982_v41 }
 0x311   : > { %v1145_v43 = vpop.f32.mrb[4].mxu0 }
 0x312   : > { %v1152_v44 = vsel %vm1151_vm5, 1e-10, %v1145_v43  ;;  %v1891_v45 = vpop.f32.mrb[5].mxu0 }
 0x313   : > { %v1153_v46 = vsel %vm732_vm2, %v1152_v44, -inf }
 0x314   : > { %1154 = vmax.xlane.f32.xlu0 %v1153_v46 }
 0x315   : > { %v1316_v47 = vpop.f32.mrb[6].mxu0 }
 0x316   : > { %v1323_v48 = vsel %vm1322_vm6, 1e-10, %v1316_v47  ;;  %v1901_v49 = vpop.f32.mrb[7].mxu0 }
 0x317   : > { %v1324_v50 = vsel %vm732_vm2, %v1323_v48, -inf }
 0x318   : > { %1325 = vmax.xlane.f32.xlu0 %v1324_v50 }
 0x321   : > { %824 = vrot.lane.b32.xlu1 %v2773_v19, %s2366_s11  ;;  %s2373_s11 = smov [#allocation14]  }
 0x329   : > { %v814_v51 = vpop.xlane.xlu0 %813 }
 0x32a   : > { %v815_v52 = vsub.f32 %v811_v33, %v814_v51  ;;  %v1934_v33 = vpack.c.bf16 %v1433_v32, %v1432_v31 }
 0x32c   : > { %v816_v53 = vmul.f32 1.442695, %v815_v52  ;;  %1935 = vmatpush3.bf16.msra.mxu0 %v1934_v33 }
 0x32e   : > { %2044 = vpow2.f32 %v816_v53 }
 0x338   : > { %v2045_v54 = vpop.eup %2044 }
 0x339   : > { %v818_v55 = vsel %vm732_vm2, %v2045_v54, 0.0 }
 0x345   : > { %819 = vadd.xlane.f32.xlu1 %v818_v55 }
 0x39d   : > { %v984_v56 = vpop.xlane.xlu1 %983 }
 0x39e   : > { %v985_v57 = vsub.f32 %v981_v39, %v984_v56 }
 0x3a0   : > { %v986_v58 = vmul.f32 1.442695, %v985_v57 }
 0x3a1   : > { %v825_v59 = vpop.permute.xlu1 %824  ;;  %v1155_v60 = vpop.xlane.xlu0 %1154 }
 0x3a2   : > { %2046 = vpow2.f32 %v986_v58  ;;  %v1156_v61 = vsub.f32 %v1152_v44, %v1155_v60  ;;  %1873 = vmatpush3.msra.mxu1 %v825_v59  ;;  %v1801_v44 = vld [vmem:[%s2947_s7] ss:$0 sm:$0xff] }
 0x3a3   : > { %1882 = vmatprep.subr.mxu1 %v2362_v1 }
 0x3a4   : > { %v1157_v62 = vmul.f32 1.442695, %v1156_v61 }
 0x3a5   : > { %v1326_v63 = vpop.xlane.xlu0 %1325 }
 0x3a6   : > { %2048 = vpow2.f32 %v1157_v62  ;;  %v1327_v2 = vsub.f32 %v1323_v48, %v1326_v63 }
 0x3a8   : > { %v1328_v3 = vmul.f32 1.442695, %v1327_v2 }
 0x3aa   : > { %2050 = vpow2.f32 %v1328_v3 }
 0x3ac   : > { %v2047_v4 = vpop.eup %2046 }
 0x3ad   : > { %v988_v5 = vsel %vm732_vm2, %v2047_v4, 0.0 }
 0x3ae   : > { %989 = vadd.xlane.f32.xlu0 %v988_v5 }
 0x3b0   : > { %v2049_v6 = vpop.eup %2048 }
 0x3b1   : > { %v1159_v7 = vsel %vm732_vm2, %v2049_v6, 0.0 }
 0x3b2   : > { %1160 = vadd.xlane.f32.xlu1 %v1159_v7 }
 0x3b4   : > { %v2051_v8 = vpop.eup %2050 }
 0x3b5   : > { %v1330_v9 = vsel %vm732_vm2, %v2051_v8, 0.0 }
 0x3b6   : > { %1331 = vadd.xlane.f32.xlu0 %v1330_v9 }
 0x3c3   : > { %1166 = vrot.lane.b32.xlu1 %v2773_v19, %s2367_s19  ;;  %s2240_s19 = sshll.u32 %s2373_s11, 4  ;;  %s2241_s19 = int_to_ptr.vmem [resolvable:$false] %s2240_s19 }
 0x3c4   : > { %p2243_p11 = scmp.lt.s32.totalorder %s2857_s27, %s2241_s19 }
 0x3c7   : > { %1337 = vrot.lane.b32.xlu1 %v2773_v19, %s2368_s30  ;;  %s2242_s30 = scalar_lea.vmem %s2241_s19, 1024 }
 0x3c8   : > { %p2244_p4 = scmp.lt.s32.totalorder %s2242_s30, %s2236_s6 }
 0x3ca   : > { %p2245_p10 = por %p2244_p4, %p2243_p11 }
 0x3cc   : > { %995 = vrot.lane.b32.xlu0 %v2773_v19, %s2369_s8  ;;  %p2246_p3 = pnand %p2245_p10, %p2239_p8 }
 0x3d2   : > { %v820_v10 = vpop.xlane.xlu1 %819 }
 0x3d3   : > { %2052 = vrcp.f32 %v820_v10 }
 0x3dd   : > { %v2053_v11 = vpop.eup %2052 }
 0x3de   : > { %v822_v12 = vmul.f32 %v2053_v11, %v2045_v54 }
 0x3e0   : > { %823 = vst.msk [vmem:[%s2818_s15] sm:$0xff] %vm732_vm2, %v822_v12  ;;  %1875 = vmatmul.mubr.msk.f32.vlgmr.msra.gmra.mrb[4].mxu1 %vm732_vm2, %v822_v12 }
 0x3e1   : > { %1884 = vmatprep.mubr.msk.f32.mxu1 %vm2361_vm0, %v2362_v1 }
 0x43b   : > { %v990_v13 = vpop.xlane.xlu0 %989 }
 0x43c   : > { %2054 = vrcp.f32 %v990_v13 }
 0x43f   : > { %v1161_v14 = vpop.xlane.xlu1 %1160 }
 0x440   : > { %2056 = vrcp.f32 %v1161_v14 }
 0x443   : > { %v1332_v16 = vpop.xlane.xlu0 %1331  ;;  %v1167_v19 = vpop.permute.xlu1 %1166 }
 0x444   : > { %2058 = vrcp.f32 %v1332_v16 }
 0x446   : > { %v2055_v17 = vpop.eup %2054 }
 0x447   : > { %v992_v18 = vmul.f32 %v2055_v17, %v2047_v4  ;;  %v996_v20 = vpop.permute.xlu0 %995  ;;  %v1338_v23 = vpop.permute.xlu1 %1337 }
 0x448   : > { %1883 = vmatpush3.msra.mxu1 %v996_v20 }
 0x449   : > { %1789 = vst.msk [vmem:[%s2818_s15 + $0x8] sm:$0xff] %vm732_vm2, %v992_v18  ;;  %1885 = vmatmul.mubr.msk.f32.vlgmr.msra.gmra.mrb[6].mxu1 %vm732_vm2, %v992_v18  ;;  %1892 = vmatprep.subr.mxu1 %v2362_v1 }
 0x44a   : > { %v2057_v21 = vpop.eup %2056  ;;  %1893 = vmatpush3.msra.mxu1 %v1167_v19  ;;  %1894 = vmatprep.mubr.msk.f32.mxu1 %vm2361_vm0, %v2362_v1 }
 0x44b   : > { %v1163_v22 = vmul.f32 %v2057_v21, %v2049_v6  ;;  %1902 = vmatprep.subr.mxu1 %v2362_v1 }
 0x44d   : > { %1794 = vst.msk [vmem:[%s2818_s15 + $0x10] sm:$0xff] %vm732_vm2, %v1163_v22  ;;  %1895 = vmatmul.mubr.msk.f32.vlgmr.msra.gmra.mrb[8].mxu1 %vm732_vm2, %v1163_v22 }
 0x44e   : > { %v2059_v24 = vpop.eup %2058  ;;  %1903 = vmatpush3.msra.mxu1 %v1338_v23  ;;  %1904 = vmatprep.mubr.msk.f32.mxu1 %vm2361_vm0, %v2362_v1 }
 0x44f   : > { %v1334_v25 = vmul.f32 %v2059_v24, %v2051_v8 }
 0x451   : > { %1799 = vst.msk [vmem:[%s2818_s15 + $0x18] sm:$0xff] %vm732_vm2, %v1334_v25  ;;  %1905 = vmatmul.mubr.msk.f32.vlgmr.msra.gmra.mrb[10].mxu1 %vm732_vm2, %v1334_v25 }
 0x4b3   : > { %v896_v26 = vpop.f32.mrb[4].mxu1 }
 0x4b4   : > { %v1876_v27 = vpop.f32.mrb[5].mxu1 }
 0x51c   : > { %v1067_v34 = vpop.f32.mrb[6].mxu1 }
 0x51d   : > { %1414 = vrot.lane.b32.xlu0 %v1067_v34, %s2370_s29  ;;  %v1886_v1 = vpop.f32.mrb[7].mxu1 }
 0x520   : > { %v1238_v35 = vpop.f32.mrb[8].mxu1 }
 0x521   : > { %1418 = vrot.lane.b32.xlu1 %v1238_v35, %s2371_s26  ;;  %v1896_v36 = vpop.f32.mrb[9].mxu1 }
 0x524   : > { %v1409_v37 = vpop.f32.mrb[10].mxu1 }
 0x525   : > { %1422 = vrot.lane.b32.xlu0 %v1409_v37, %s2372_s13  ;;  %v1906_v38 = vpop.f32.mrb[11].mxu1 }
 0x58f   : > { %v1415_v39 = vpop.permute.xlu0 %1414 }
 0x590   : > { %v1425_v40 = vsel %vm732_vm2, %v896_v26, %v1415_v39 }
 0x593   : > { %v1419_v0 = vpop.permute.xlu1 %1418 }
 0x594   : > { %v1427_v41 = vsel %vm1426_vm7, %v1425_v40, %v1419_v0 }
 0x597   : > { %v1423_v42 = vpop.permute.xlu0 %1422 }
 0x598   : > { %v1429_v43 = vsel %vm1428_vm8, %v1427_v41, %v1423_v42 }
 0x599   : > { %1916 = vmatmul.mubr.msk.f32.vlgmr.msra.gmra.mrb[8].mxu0 %vm573_vm1, %v1429_v43 }
 0x66c   : > { %v1510_v45 = vpop.f32.mrb[8].mxu0 }
 0x66d   : > { %v1511_v46 = vadd.f32 %v1801_v44, %v1510_v45  ;;  %v1917_v47 = vpop.f32.mrb[9].mxu0 }
 0x66f   : > { %v1514_v48 = vadd.f32 %v1511_v46, %v2756_v15 }
 0x671   : > { %v1515_v49 = vsel %vm573_vm1, %v1514_v48, 0.0 }
 0x672   : > { %1516 = vadd.xlane.f32.xlu1 %v1515_v49 }
 0x6ff   : > { %v1517_v50 = vpop.xlane.xlu1 %1516 }
 0x700   : > { %v1519_v51 = vmul.f32 0.03125, %v1517_v50 }
 0x702   : > { %v1520_v52 = vsub.f32 %v1514_v48, %v1519_v51 }
 0x704   : > { %v1521_v53 = vmul.f32 %v1520_v52, %v1520_v52 }
 0x706   : > { %v1522_v54 = vsel %vm573_vm1, %v1521_v53, 0.0 }
 0x707   : > { %1523 = vadd.xlane.f32.xlu0 %v1522_v54 }
 0x708   : > { %2249 = shalt.err (!%p2246_p3)
}
 0x709   : > { %s2250_s8 = scalar_lea.hbm %s2855_s2, 512  ;;  %s2254_s13 = scalar_lea.hbm %s3000_s17, 1024 }
 0x70a   : > { %p2251_p9 = scmp.ne.s32.totalorder %s2855_s2, %s2250_s8  ;;  %p2255_p7 = scmp.lt.u32.totalorder %s2855_s2, %s3000_s17 }
 0x70b   : > { %p2256_p12 = scmp.lt.u32.totalorder %s2254_s13, %s2250_s8  ;;  %p2258_p2 = scmp.lt.u32.totalorder %s2250_s8, %s2855_s2 }
 0x70c   : > { %p2252_p6 = pnand %p2251_p9, %p3001_p5 }
 0x70d   : > { %p2257_p1 = por %p2256_p12, %p2255_p7 }
 0x70e   : > { %p2253_p13 = pneg %p2252_p6 }
 0x70f   : > { %p2259_p0 = por %p2258_p2, %p2257_p1 }
 0x711   : > { %p2260_p8 = pnand %p2259_p0, %p2253_p13 }
 0x713   : > { %2263 = shalt.err (!%p2260_p8)
}
 0x714   : > { %s2374_s14 = smov 128   ;;  %s3002_s6 = sld [smem:[#allocation30_spill]] }
 0x715   : > { %1955 = dma.vmem_to_hbm [thread:$0]  (%p3001_p5), %s2857_s27, 512, %s2855_s2, %s1552_s0, %s2374_s14, %s2374_s14, %s2370_s29  }
 0x716   : > { %s3003_s30 = sld [smem:[#allocation31_spill]]  ;;  %s1807_s8 = sshll.u32 %s2462_s25, 7 }
 0x717   : > { %s552_s15 = scalar_lea.vmem [#allocation13], %s2712_s28  ;;  %s3004_s2 = sld [smem:[#allocation32_spill]] }
 0x718   : > { %s1565_s26 = sshll.u32 %s552_s15, 4  ;;  %s1547_s13 = scalar_lea.sflag [#allocation4], %s2709_s20  ;;  %s2897_s26 = int_to_ptr.vmem [resolvable:$true] %s1565_s26 }
 0x719   : > { %s2264_s9 = scalar_lea.vmem %s2897_s26, 128  ;;  %s2375_s25 = smov [#allocation13]  }
 0x71a   : > { %v1803_v58 = vld [vmem:[%s3002_s6] ss:$0 sm:$0xff]  ;;  %p2265_p11 = scmp.ne.s32.totalorder %s2897_s26, %s2264_s9  ;;  %s2268_s28 = sshll.u32 %s2375_s25, 4  ;;  %s2269_s28 = int_to_ptr.vmem [resolvable:$false] %s2268_s28 }
 0x71b   : > { %s2270_s4 = scalar_lea.vmem %s2269_s28, 256  ;;  %p2271_p3 = scmp.lt.s32.totalorder %s2897_s26, %s2269_s28 }
 0x71c   : > { %v1804_v60 = vld [vmem:[%s3003_s30] ss:$0 sm:$0xff]  ;;  %p2266_p4 = pnand %p2265_p11, %p3001_p5  ;;  %p2272_p9 = scmp.lt.s32.totalorder %s2270_s4, %s2264_s9 }
 0x71d   : > { %s2895_s0 = scalar_lea.hbm %s3004_s2, %s1807_s8 }
 0x71e   : > { %p2267_p10 = pneg %p2266_p4  ;;  %p2273_p6 = por %p2272_p9, %p2271_p3 }
 0x720   : > { %p2274_p13 = pnand %p2273_p6, %p2267_p10 }
 0x794   : > { %v1524_v15 = vpop.xlane.xlu0 %1523 }
 0x795   : > { %v1525_v55 = vmul.f32 0.03125, %v1524_v15 }
 0x797   : > { %v1526_v56 = vadd.f32 1e-05, %v1525_v55 }
 0x799   : > { %2060 = vrsqrt.f32 %v1526_v56 }
 0x7a3   : > { %v2061_v57 = vpop.eup %2060 }
 0x7a4   : > { %v1528_v59 = vmul.f32 %v2061_v57, %v1520_v52 }
 0x7a6   : > { %v1536_v61 = vmul.f32 %v1803_v58, %v1528_v59 }
 0x7a8   : > { %v1544_v62 = vadd.f32 %v1804_v60, %v1536_v61 }
 0x7aa   : > { %1545 = vst.msk [vmem:[%s552_s15] sm:$0xff] %vm573_vm1, %v1544_v62 }
 0x7ab   : > { %2277 = shalt.err (!%p2274_p13)
}
 0x7ac   : > { %s2278_s20 = scalar_lea.hbm %s2895_s0, 128  ;;  %s2282_s16 = scalar_lea.hbm %s3004_s2, 256 }
 0x7ad   : > { %p2279_p7 = scmp.ne.s32.totalorder %s2895_s0, %s2278_s20  ;;  %p2283_p2 = scmp.lt.u32.totalorder %s2895_s0, %s3004_s2 }
 0x7ae   : > { %p2284_p0 = scmp.lt.u32.totalorder %s2282_s16, %s2278_s20  ;;  %p2286_p11 = scmp.lt.u32.totalorder %s2278_s20, %s2895_s0 }
 0x7af   : > { %p2280_p12 = pnand %p2279_p7, %p3001_p5 }
 0x7b0   : > { %p2285_p8 = por %p2284_p0, %p2283_p2 }
 0x7b1   : > { %p2281_p1 = pneg %p2280_p12 }
 0x7b2   : > { %p2287_p4 = por %p2286_p11, %p2285_p8 }
 0x7b4   : > { %p2288_p10 = pnand %p2287_p4, %p2281_p1 }
 0x7b6   : > { %2291 = shalt.err (!%p2288_p10)
}
 0x7b7   : > { %1954 = dma.vmem_to_hbm [thread:$0]  (%p3001_p5), %s2897_s26, 128, %s2895_s0, %s1547_s13  }
 0x7b8 PF: > { %s3005_s19 = sld [smem:[#allocation23_spill]]  ;;  %s3006_s30 = sld [smem:[#allocation24_spill]] }
 0x7b9   : > { %p3008_p9 = scmp.ge.s32.totalorder %s2350_s24, 2 }
 0x7be   : > { %s1593_s8 = sand.u32 1, %s3005_s19   ;;  %p3007_p3 = scmp.ne.s32.totalorder %s3006_s30, 0 }
 0x7bf   : > { %s1594_s15 = scalar_lea.sflag [#allocation4], %s1593_s8 }
 0x7c0   : > { %p1979_p6 = pnand %p3008_p9, %p3007_p3 }
 0x7c2   : > { %2329 = dma.done.wait (!%p1979_p6), %s1594_s15, 128  }
 0x7c3   : > { %2331 = vsyncadd (!%p1979_p6), %s1594_s15, 4294967168  ;;  %s1603_s29 = scalar_lea.sflag [#allocation15], %s1593_s8 }
 0x7c4   : > { %2333 = dma.done.wait (!%p1979_p6), %s1603_s29, 512  }
 0x7c5   : > { %2335 = vsyncadd (!%p1979_p6), %s1603_s29, 4294966784  ;;  %s3009_s12 = sld [smem:[#allocation25_spill]]  ;;  %s3010_s27 = smov %s2581_s21 }
 0x7c6   : > { %p36_p5 = scmp.ge.s32.totalorder %s2581_s21, 4   ;;  %s3011_s21 = smov %s2342_s22 }
 0x7c7   : > { %s3012_s22 = smov %s2346_s23  ;;  %s3014_s24 = smov %s3010_s27 }
 0x7c8   :  { %38 = sbr.rel (!%p36_p5) target bundleno = 21 (0x15), region = 170 }
 0x7cb   : > { %s3013_s23 = smov %s3009_s12 }
 0x7cf   :  { %1608 = vsyncpa [#allocation3], 1 }
 0x7d0   :  { %1610 = vsyncpa [#allocation3 + $0x1], 1 }
 0x7d1   :  { %1611 = vsyncpa [#allocation6], 1 }
 0x7d2   :  { %1613 = vsyncpa [#allocation6 + $0x1], 1 }
 0x7d3   :  { %1614 = vsyncpa [#allocation9], 1 }
 0x7d4   :  { %1615 = vsyncpa [#allocation12], 1 }
 0x7d5   :  { %1617 = vsyncpa [#allocation12 + $0x1], 1 }
 0x7d6   :  { %1618 = vsyncpa [#allocation4], 1 }
 0x7d7   :  { %1620 = vsyncpa [#allocation4 + $0x1], 1 }
 0x7d8   :  { %1621 = vsyncpa [#allocation15], 1 }
 0x7d9   :  { %1623 = vsyncpa [#allocation15 + $0x1], 1 }

</bundles_post_ra>
